<compile_context>
chip_gen: v7x
topology: tpu7x:2x2x1
jax: 0.10.0
libtpu: 0.0.40
codegen_flags: <defaults>
</compile_context>

<pallas_src>
import jax
import jax.numpy as jnp
from jax.experimental import pallas as pl
from jax.experimental.pallas import tpu as pltpu


def _round_up(x, m):
    return ((x + m - 1) // m) * m


def critic_kernel(x_ref, w1_ref, b1_ref, w2_ref, b2_ref, w3_ref, b3_ref, o_ref):
    # fc1 + ReLU: bf16 x bf16 MXU matmul, f32 accumulation, f32 elementwise.
    h1 = jnp.dot(x_ref[...], w1_ref[...], preferred_element_type=jnp.float32)
    h1 = jnp.maximum(h1 + b1_ref[...], 0.0)

    # fc2 + ReLU.
    h2 = jnp.dot(h1.astype(w2_ref.dtype), w2_ref[...],
                 preferred_element_type=jnp.float32)
    h2 = jnp.maximum(h2 + b2_ref[...], 0.0)

    # Value head (F2 -> 1): VPU multiply + lane reduction (skips a 1-column MXU matmul).
    w3 = w3_ref[...].astype(jnp.float32)                       # (1, F2)
    v = jnp.sum(h2 * w3, axis=-1, keepdims=True) + b3_ref[...]  # (TILE_B, 1)
    o_ref[...] = v.astype(o_ref.dtype)


def critic_forward(state, params, *, tile_b=1024, operand_dtype=jnp.bfloat16):
    """Fused 3-layer MLP critic on TPU via Pallas.

    state:  (B, input_dims) float32
    params: dict with w1 (D,F1), b1 (1,F1), w2 (F1,F2), b2 (1,F2), w3 (F2,1), b3 (1,1)
    returns (B, 1) float32 value estimates.
    """
    B, D = state.shape
    F1 = params["w1"].shape[1]
    F2 = params["w2"].shape[1]

    # Batch tiling: TILE_B a multiple of 8, no bigger than the (padded) batch.
    tile_b = _round_up(max(8, min(tile_b, _round_up(B, 8))), 8)
    num_tiles = pl.cdiv(B, tile_b)
    b_pad = num_tiles * tile_b

    # MXU operands in bf16 (halved HBM stream); biases stay f32.
    x = state.astype(operand_dtype)
    if b_pad != B:
        x = jnp.pad(x, ((0, b_pad - B), (0, 0)))
    w1 = params["w1"].astype(operand_dtype)
    w2 = params["w2"].astype(operand_dtype)
    w3 = params["w3"].reshape(1, F2).astype(operand_dtype)  # row layout for the VPU head
    b1 = params["b1"].astype(jnp.float32)
    b2 = params["b2"].astype(jnp.float32)
    b3 = params["b3"].astype(jnp.float32)

    weight_bytes = sum(a.size * a.dtype.itemsize for a in (w1, b1, w2, b2, w3, b3))
    cost = pl.CostEstimate(
        flops=2 * b_pad * (D * F1 + F1 * F2 + F2),
        transcendentals=0,
        bytes_accessed=x.size * x.dtype.itemsize + weight_bytes + b_pad * 4,
    )

    out = pl.pallas_call(
        critic_kernel,
        out_shape=jax.ShapeDtypeStruct((b_pad, 1), jnp.float32),
        grid=(num_tiles,),
        in_specs=[
            pl.BlockSpec((tile_b, D), lambda i: (i, 0)),   # streamed state tile
            pl.BlockSpec((D, F1), lambda i: (0, 0)),       # resident weights / biases
            pl.BlockSpec((1, F1), lambda i: (0, 0)),
            pl.BlockSpec((F1, F2), lambda i: (0, 0)),
            pl.BlockSpec((1, F2), lambda i: (0, 0)),
            pl.BlockSpec((1, F2), lambda i: (0, 0)),
            pl.BlockSpec((1, 1), lambda i: (0, 0)),
        ],
        out_specs=pl.BlockSpec((tile_b, 1), lambda i: (i, 0)),
        compiler_params=pltpu.CompilerParams(
            dimension_semantics=("parallel",),     # v7x: shard batch steps across both TCs
            vmem_limit_bytes=32 * 1024 * 1024,     # safe on v5e/v6e/v7x
        ),
        cost_estimate=cost,
    )(x, w1, b1, w2, b2, w3, b3)

    return out[:B] if b_pad != B else out


def init_critic_params(key, input_dims, fc1_dims, fc2_dims):
    """Deterministic PyTorch-style (uniform +-1/sqrt(fan_in)) init, f32 master copy."""
    ks = jax.random.split(key, 6)

    def lin(kw, kb, fan_in, fan_out):
        bound = 1.0 / jnp.sqrt(fan_in)
        w = jax.random.uniform(kw, (fan_in, fan_out), jnp.float32, -bound, bound)
        b = jax.random.uniform(kb, (1, fan_out), jnp.float32, -bound, bound)
        return w, b

    w1, b1 = lin(ks[0], ks[1], input_dims, fc1_dims)
    w2, b2 = lin(ks[2], ks[3], fc1_dims, fc2_dims)
    w3, b3 = lin(ks[4], ks[5], fc2_dims, 1)
    return {"w1": w1, "b1": b1, "w2": w2, "b2": b2, "w3": w3, "b3": b3}


def critic_forward_ref(state, p, operand_dtype=jnp.bfloat16):
    """Pure-JAX reference mirroring the kernel's dtype path (bf16 operands, f32 acc)."""
    x = state.astype(operand_dtype)
    w1 = p["w1"].astype(operand_dtype)
    w2 = p["w2"].astype(operand_dtype)
    w3 = p["w3"].astype(operand_dtype).astype(jnp.float32)
    h1 = jnp.maximum(
        jnp.dot(x, w1, preferred_element_type=jnp.float32) + p["b1"], 0.0)
    h2 = jnp.maximum(
        jnp.dot(h1.astype(operand_dtype), w2,
                preferred_element_type=jnp.float32) + p["b2"], 0.0)
    return h2 @ w3 + p["b3"]


if __name__ == "__main__":
    # Shapes consistent with the module's constructor: input_dims=16, fc1=32, fc2=32.
    # B=1000 with tile_b=512 exercises the batch grid (2 steps) and tail padding.
    B, D, F1, F2 = 1000, 16, 32, 32

    key = jax.random.PRNGKey(0)
    k_state, k_params = jax.random.split(key)
    state = jax.random.normal(k_state, (B, D), dtype=jnp.float32)
    params = init_critic_params(k_params, D, F1, F2)

    value = critic_forward(state, params, tile_b=512)
    value = jax.block_until_ready(value)

    ref = critic_forward_ref(state, params)
    assert value.shape == (B, 1)
    assert jnp.allclose(value, ref, atol=5e-3, rtol=5e-3), float(
        jnp.max(jnp.abs(value - ref)))

    print("KERNEL_OK")
</pallas_src>

<mosaic_0001>
module attributes {stable_mosaic.version = 11 : i64} {
  func.func @critic_kernel(%arg0: i32, %arg1: memref<512x16xbf16, #tpu.memory_space<vmem>>, %arg2: memref<16x32xbf16, #tpu.memory_space<vmem>>, %arg3: memref<1x32xf32, #tpu.memory_space<vmem>>, %arg4: memref<32x32xbf16, #tpu.memory_space<vmem>>, %arg5: memref<1x32xf32, #tpu.memory_space<vmem>>, %arg6: memref<1x32xbf16, #tpu.memory_space<vmem>>, %arg7: memref<1x1xf32, #tpu.memory_space<vmem>>, %arg8: memref<512x1xf32, #tpu.memory_space<vmem>>) attributes {dimension_semantics = [#tpu.dimension_semantics<parallel>], iteration_bounds = array<i64: 2>, scalar_prefetch = 0 : i64, scratch_operands = 0 : i64, tpu.core_type = #tpu.core_type<tc>, window_params = [{transform_indices = @transform_0, window_bounds = array<i64: 512, 16>}, {pipeline_mode = #tpu.pipeline_mode<synchronous>, transform_indices = @transform_1, window_bounds = array<i64: 16, 32>}, {pipeline_mode = #tpu.pipeline_mode<synchronous>, transform_indices = @transform_2, window_bounds = array<i64: 1, 32>}, {pipeline_mode = #tpu.pipeline_mode<synchronous>, transform_indices = @transform_3, window_bounds = array<i64: 32, 32>}, {pipeline_mode = #tpu.pipeline_mode<synchronous>, transform_indices = @transform_4, window_bounds = array<i64: 1, 32>}, {pipeline_mode = #tpu.pipeline_mode<synchronous>, transform_indices = @transform_5, window_bounds = array<i64: 1, 32>}, {pipeline_mode = #tpu.pipeline_mode<synchronous>, transform_indices = @transform_6, window_bounds = array<i64: 1, 1>}, {transform_indices = @transform_7, window_bounds = array<i64: 512, 1>}]} {
    %c0 = arith.constant 0 : index
    %c0_0 = arith.constant 0 : index
    %0 = vector.load %arg1[%c0, %c0_0] : memref<512x16xbf16, #tpu.memory_space<vmem>>, vector<512x16xbf16>
    %c0_1 = arith.constant 0 : index
    %c0_2 = arith.constant 0 : index
    %1 = vector.load %arg2[%c0_1, %c0_2] : memref<16x32xbf16, #tpu.memory_space<vmem>>, vector<16x32xbf16>
    %cst = arith.constant dense<0.000000e+00> : vector<512x32xf32>
    %2 = tpu.matmul %0, %1, %cst {dimension_numbers = #tpu.dot_dimension_numbers<[1], [0], [0], [1], [0, 0, 1, 1], [], []>} : vector<512x16xbf16>, vector<16x32xbf16>, vector<512x32xf32> -> vector<512x32xf32>
    %c0_3 = arith.constant 0 : index
    %c0_4 = arith.constant 0 : index
    %3 = vector.load %arg3[%c0_3, %c0_4] : memref<1x32xf32, #tpu.memory_space<vmem>>, vector<1x32xf32>
    %4 = vector.broadcast %3 : vector<1x32xf32> to vector<512x32xf32>
    %5 = arith.addf %2, %4 : vector<512x32xf32>
    %cst_5 = arith.constant 0.000000e+00 : f32
    %6 = vector.broadcast %cst_5 : f32 to vector<512x32xf32>
    %7 = arith.maximumf %5, %6 : vector<512x32xf32>
    %8 = arith.truncf %7 : vector<512x32xf32> to vector<512x32xbf16>
    %c0_6 = arith.constant 0 : index
    %c0_7 = arith.constant 0 : index
    %9 = vector.load %arg4[%c0_6, %c0_7] : memref<32x32xbf16, #tpu.memory_space<vmem>>, vector<32x32xbf16>
    %cst_8 = arith.constant dense<0.000000e+00> : vector<512x32xf32>
    %10 = tpu.matmul %8, %9, %cst_8 {dimension_numbers = #tpu.dot_dimension_numbers<[1], [0], [0], [1], [0, 0, 1, 1], [], []>} : vector<512x32xbf16>, vector<32x32xbf16>, vector<512x32xf32> -> vector<512x32xf32>
    %c0_9 = arith.constant 0 : index
    %c0_10 = arith.constant 0 : index
    %11 = vector.load %arg5[%c0_9, %c0_10] : memref<1x32xf32, #tpu.memory_space<vmem>>, vector<1x32xf32>
    %12 = vector.broadcast %11 : vector<1x32xf32> to vector<512x32xf32>
    %13 = arith.addf %10, %12 : vector<512x32xf32>
    %cst_11 = arith.constant 0.000000e+00 : f32
    %14 = vector.broadcast %cst_11 : f32 to vector<512x32xf32>
    %15 = arith.maximumf %13, %14 : vector<512x32xf32>
    %c0_12 = arith.constant 0 : index
    %c0_13 = arith.constant 0 : index
    %16 = vector.load %arg6[%c0_12, %c0_13] : memref<1x32xbf16, #tpu.memory_space<vmem>>, vector<1x32xbf16>
    %17 = arith.extf %16 : vector<1x32xbf16> to vector<1x32xf32>
    %18 = vector.broadcast %17 : vector<1x32xf32> to vector<512x32xf32>
    %19 = arith.mulf %15, %18 : vector<512x32xf32>
    %cst_14 = arith.constant dense<0.000000e+00> : vector<512xf32>
    %20 = vector.multi_reduction <add>, %19, %cst_14 [1] : vector<512x32xf32> to vector<512xf32>
    %21 = vector.shape_cast %20 : vector<512xf32> to vector<512x1xf32>
    %c0_15 = arith.constant 0 : index
    %c0_16 = arith.constant 0 : index
    %22 = vector.load %arg7[%c0_15, %c0_16] : memref<1x1xf32, #tpu.memory_space<vmem>>, vector<1x1xf32>
    %23 = vector.broadcast %22 : vector<1x1xf32> to vector<512x1xf32>
    %24 = arith.addf %21, %23 : vector<512x1xf32>
    %c0_17 = arith.constant 0 : index
    %c0_18 = arith.constant 0 : index
    %25 = vector.load %arg8[%c0_17, %c0_18] : memref<512x1xf32, #tpu.memory_space<vmem>>, vector<512x1xf32>
    tpu.vector_store %arg8[%c0_17, %c0_18], %24 {strides = array<i32>} : memref<512x1xf32, #tpu.memory_space<vmem>>, vector<512x1xf32>,
    return
  }
  func.func @transform_0(%arg0: i32) -> (i32, i32) {
    %c0_i32 = arith.constant 0 : i32
    %c0_i32_0 = arith.constant 0 : i32
    return %arg0, %c0_i32 : i32, i32
  }
  func.func @transform_1(%arg0: i32) -> (i32, i32) {
    %c0_i32 = arith.constant 0 : i32
    %c0_i32_0 = arith.constant 0 : i32
    %c0_i32_1 = arith.constant 0 : i32
    return %c0_i32, %c0_i32_0 : i32, i32
  }
  func.func @transform_2(%arg0: i32) -> (i32, i32) {
    %c0_i32 = arith.constant 0 : i32
    %c0_i32_0 = arith.constant 0 : i32
    %c0_i32_1 = arith.constant 0 : i32
    return %c0_i32, %c0_i32_0 : i32, i32
  }
  func.func @transform_3(%arg0: i32) -> (i32, i32) {
    %c0_i32 = arith.constant 0 : i32
    %c0_i32_0 = arith.constant 0 : i32
    %c0_i32_1 = arith.constant 0 : i32
    return %c0_i32, %c0_i32_0 : i32, i32
  }
  func.func @transform_4(%arg0: i32) -> (i32, i32) {
    %c0_i32 = arith.constant 0 : i32
    %c0_i32_0 = arith.constant 0 : i32
    %c0_i32_1 = arith.constant 0 : i32
    return %c0_i32, %c0_i32_0 : i32, i32
  }
  func.func @transform_5(%arg0: i32) -> (i32, i32) {
    %c0_i32 = arith.constant 0 : i32
    %c0_i32_0 = arith.constant 0 : i32
    %c0_i32_1 = arith.constant 0 : i32
    return %c0_i32, %c0_i32_0 : i32, i32
  }
  func.func @transform_6(%arg0: i32) -> (i32, i32) {
    %c0_i32 = arith.constant 0 : i32
    %c0_i32_0 = arith.constant 0 : i32
    %c0_i32_1 = arith.constant 0 : i32
    return %c0_i32, %c0_i32_0 : i32, i32
  }
  func.func @transform_7(%arg0: i32) -> (i32, i32) {
    %c0_i32 = arith.constant 0 : i32
    %c0_i32_0 = arith.constant 0 : i32
    return %arg0, %c0_i32 : i32, i32
  }
}

</mosaic_0001>

<bundles_post_ra>
// kernel: tpu_custom_call.1
= control target key start
LH: loop header
LB: loop body
LE: loop exit
PB: predicated region body
PF: predicated region fallthrough
CT: control target
= control target key end

     0   :  { %s2341_s26 = smov 0   ;;  %s2936_s0 = inlined_call_operand.vmem [shape: bf16[1024,16], index: 0, kind: input, shape index: {}]   ;;  %s2937_s1 = inlined_call_operand.vmem [shape: bf16[16,32], index: 1, kind: input, shape index: {}]   ;;  %s2938_s2 = inlined_call_operand.vmem [shape: f32[1,32], index: 2, kind: input, shape index: {}]   ;;  %s2939_s3 = inlined_call_operand.vmem [shape: bf16[32,32], index: 3, kind: input, shape index: {}]   ;;  %s2940_s4 = inlined_call_operand.vmem [shape: f32[1,32], index: 4, kind: input, shape index: {}]   ;;  %s2941_s5 = inlined_call_operand.vmem [shape: bf16[1,32], index: 5, kind: input, shape index: {}]   ;;  %s2942_s6 = inlined_call_operand.<no memory space> [shape: f32[1,1], index: 6, kind: input, shape index: {}]   ;;  %s2943_s7 = inlined_call_operand.vmem [shape: f32[1024,1], index: 7, kind: output, shape index: {}]  }
   0x1   :  { %v12_v0 = vstv %s2942_s6 }
   0x2   :  { %13 = vst [vmem:[#allocation2] sm:$0x1] %v12_v0 }
   0x3 LB: > { %s1933_s27 = sadd.s32 4294967295, %s2296_s26   ;;  %p1937_p0 = scmp.ge.s32.totalorder %s2296_s26, 1  ;;  %s2296_s26 = sphi %s2341_s26, %s19_s26  }
   0x4   : > { %p240_p1 = scmp.lt.s32.totalorder %s2296_s26, 3 }
   0x6   : > { %p241_p2 = pnand %p1937_p0, %p240_p1 }
   0x7   : > { %v2255_v1 = vld [vmem:[%s2937_s1] sm:$0xff] (!%p241_p2)   ;;  %s1938_s6 = sshll.u32 (!%p241_p2), %s1933_s27, 6  ;;  %vm524_vm0 = vcmask (!%p241_p2), 130048   ;;  %v2289_v28 = vld [vmem:[%s2939_s3 + $0x8] sm:$0xff] (!%p241_p2)   ;;  %vm1029_vm1 = vcmask (!%p241_p2), 261120   ;;  %vm1812_vm2 = vcmask (!%p241_p2), 7168  }
   0x8   : > { %244 = sbr.rel (%p241_p2) target bundleno = 733 (0x2dd), region = 48  ;;  %p273_p3 = scmp.lt.s32.totalorder (!%p241_p2), %s1938_s6, 127  ;;  %2113 = vmatprep.subr.bf16.mxu0 (!%p241_p2), %v2255_v1  ;;  %v2288_v26 = vld [vmem:[%s2939_s3] sm:$0xff] (!%p241_p2)  }
   0x9   : > { %2114 = vmatpush3.bf16.msra.mxu0 (!%p241_p2), %v2255_v1  ;;  %2179 = vmatprep.subr.bf16.mxu1 (!%p241_p2), %v2288_v26  ;;  %v2433_v36 = vld [vmem:[%s2938_s2] ss:$0 sm:$0xff] (!%p241_p2) }
   0xa   : > { %2180 = vmatpush3.bf16.msra.mxu1 (!%p241_p2), %v2288_v26 }
   0xb   : > { %2181 = vmatprep.subr.bf16.mxu1 (!%p241_p2), %v2289_v28 }
   0xe   : > { %2182 = vmatpush3.bf16.msra.mxu1 (!%p241_p2), %v2289_v28 }
   0xf   : > { %s2945_s6 = smov (!%p273_p3, %s1938_s6), 127 }
  0x10   : > { %s1939_s30 = sshll.u32 %s2945_s6, 2  ;;  %s1941_s21 = sshll.u32 %s2945_s6, 3 }
  0x11   : > { %s2358_s10 = scalar_lea.vmem %s2936_s0, %s1939_s30  ;;  %s2739_s24 = scalar_lea.vmem %s2943_s7, %s1941_s21 }
  0x12   : > { %v2256_v2 = vld [vmem:[%s2358_s10] sm:$0xff]   ;;  %v2257_v3 = vld [vmem:[%s2358_s10 + $0x8] sm:$0xff]   ;;  %v2258_v4 = vld [vmem:[%s2358_s10 + $0x10] sm:$0xff]  }
  0x13   : > { %2115 = vmatprep.mubr.msk.bf16.mxu0 %vm524_vm0, %v2256_v2  ;;  %v2259_v5 = vld [vmem:[%s2358_s10 + $0x18] sm:$0xff]   ;;  %v2260_v6 = vld [vmem:[%s2358_s10 + $0x20] sm:$0xff]   ;;  %v2261_v7 = vld [vmem:[%s2358_s10 + $0x28] sm:$0xff]  }
  0x14   : > { %2116 = vmatmul.mubr.msk.bf16.vlgmr.msra.gmra.mrb[0].mxu0 %vm524_vm0, %v2257_v3  ;;  %v2262_v8 = vld [vmem:[%s2358_s10 + $0x30] sm:$0xff]   ;;  %v2263_v9 = vld [vmem:[%s2358_s10 + $0x38] sm:$0xff]   ;;  %v2264_v10 = vld [vmem:[%s2358_s10 + $0x40] sm:$0xff]  }
  0x15   : > { %2119 = vmatprep.mubr.msk.bf16.mxu0 %vm524_vm0, %v2258_v4  ;;  %v2265_v11 = vld [vmem:[%s2358_s10 + $0x48] sm:$0xff]   ;;  %v2266_v12 = vld [vmem:[%s2358_s10 + $0x50] sm:$0xff]   ;;  %v2267_v13 = vld [vmem:[%s2358_s10 + $0x58] sm:$0xff]  }
  0x16   : > { %v2268_v14 = vld [vmem:[%s2358_s10 + $0x60] sm:$0xff]   ;;  %v2269_v15 = vld [vmem:[%s2358_s10 + $0x68] sm:$0xff]   ;;  %v2270_v16 = vld [vmem:[%s2358_s10 + $0x70] sm:$0xff]  }
  0x17   : > { %v2271_v17 = vld [vmem:[%s2358_s10 + $0x78] sm:$0xff]   ;;  %v2272_v18 = vld [vmem:[%s2358_s10 + $0x80] sm:$0xff]   ;;  %v2273_v19 = vld [vmem:[%s2358_s10 + $0x88] sm:$0xff]  }
  0x18   : > { %v2274_v20 = vld [vmem:[%s2358_s10 + $0x90] sm:$0xff]   ;;  %v2275_v21 = vld [vmem:[%s2358_s10 + $0x98] sm:$0xff]   ;;  %v2276_v22 = vld [vmem:[%s2358_s10 + $0xa0] sm:$0xff]  }
  0x19   : > { %v2277_v23 = vld [vmem:[%s2358_s10 + $0xa8] sm:$0xff]   ;;  %v2278_v24 = vld [vmem:[%s2358_s10 + $0xb0] sm:$0xff]   ;;  %v2279_v25 = vld [vmem:[%s2358_s10 + $0xb8] sm:$0xff]  }
  0x1a   : > { %v2280_v27 = vld [vmem:[%s2358_s10 + $0xc0] sm:$0xff]   ;;  %v2281_v29 = vld [vmem:[%s2358_s10 + $0xc8] sm:$0xff]   ;;  %v2282_v30 = vld [vmem:[%s2358_s10 + $0xd0] sm:$0xff]  }
  0x1b   : > { %v2283_v31 = vld [vmem:[%s2358_s10 + $0xd8] sm:$0xff]   ;;  %v2284_v32 = vld [vmem:[%s2358_s10 + $0xe0] sm:$0xff]   ;;  %v2285_v33 = vld [vmem:[%s2358_s10 + $0xe8] sm:$0xff]  }
  0x1c   : > { %2120 = vmatmul.mubr.msk.bf16.gmra.mrb[4].mxu0 %vm524_vm0, %v2259_v5  ;;  %v2286_v34 = vld [vmem:[%s2358_s10 + $0xf0] sm:$0xff]   ;;  %v2287_v35 = vld [vmem:[%s2358_s10 + $0xf8] sm:$0xff]  }
  0x1d   : > { %2123 = vmatprep.mubr.msk.bf16.mxu0 %vm524_vm0, %v2260_v6 }
  0x24   : > { %2124 = vmatmul.mubr.msk.bf16.gmra.mrb[8].mxu0 %vm524_vm0, %v2261_v7 }
  0x25   : > { %2127 = vmatprep.mubr.msk.bf16.mxu0 %vm524_vm0, %v2262_v8 }
  0x2c   : > { %2128 = vmatmul.mubr.msk.bf16.gmra.mrb[12].mxu0 %vm524_vm0, %v2263_v9 }
  0x2d   : > { %2131 = vmatprep.mubr.msk.bf16.mxu0 %vm524_vm0, %v2264_v10 }
  0x34   : > { %2132 = vmatmul.mubr.msk.bf16.gmra.mrb[16].mxu0 %vm524_vm0, %v2265_v11 }
  0x35   : > { %2135 = vmatprep.mubr.msk.bf16.mxu0 %vm524_vm0, %v2266_v12 }
  0x3c   : > { %2136 = vmatmul.mubr.msk.bf16.gmra.mrb[20].mxu0 %vm524_vm0, %v2267_v13 }
  0x3d   : > { %2139 = vmatprep.mubr.msk.bf16.mxu0 %vm524_vm0, %v2268_v14 }
  0x44   : > { %2140 = vmatmul.mubr.msk.bf16.gmra.mrb[24].mxu0 %vm524_vm0, %v2269_v15 }
  0x45   : > { %2143 = vmatprep.mubr.msk.bf16.mxu0 %vm524_vm0, %v2270_v16 }
  0x4c   : > { %2144 = vmatmul.mubr.msk.bf16.gmra.mrb[28].mxu0 %vm524_vm0, %v2271_v17 }
  0x4d   : > { %2147 = vmatprep.mubr.msk.bf16.mxu0 %vm524_vm0, %v2272_v18 }
  0x54   : > { %2148 = vmatmul.mubr.msk.bf16.gmra.mrb[32].mxu0 %vm524_vm0, %v2273_v19 }
  0x55   : > { %2151 = vmatprep.mubr.msk.bf16.mxu0 %vm524_vm0, %v2274_v20 }
  0x5c   : > { %2152 = vmatmul.mubr.msk.bf16.gmra.mrb[36].mxu0 %vm524_vm0, %v2275_v21 }
  0x5d   : > { %2155 = vmatprep.mubr.msk.bf16.mxu0 %vm524_vm0, %v2276_v22 }
  0x64   : > { %2156 = vmatmul.mubr.msk.bf16.gmra.mrb[40].mxu0 %vm524_vm0, %v2277_v23 }
  0x65   : > { %2159 = vmatprep.mubr.msk.bf16.mxu0 %vm524_vm0, %v2278_v24 }
  0x6c   : > { %2160 = vmatmul.mubr.msk.bf16.gmra.mrb[44].mxu0 %vm524_vm0, %v2279_v25 }
  0x6d   : > { %2163 = vmatprep.mubr.msk.bf16.mxu0 %vm524_vm0, %v2280_v27 }
  0x74   : > { %2164 = vmatmul.mubr.msk.bf16.gmra.mrb[48].mxu0 %vm524_vm0, %v2281_v29 }
  0x75   : > { %2167 = vmatprep.mubr.msk.bf16.mxu0 %vm524_vm0, %v2282_v30 }
  0x7c   : > { %2168 = vmatmul.mubr.msk.bf16.gmra.mrb[52].mxu0 %vm524_vm0, %v2283_v31 }
  0x7d   : > { %2171 = vmatprep.mubr.msk.bf16.mxu0 %vm524_vm0, %v2284_v32 }
  0x84   : > { %2172 = vmatmul.mubr.msk.bf16.gmra.mrb[56].mxu0 %vm524_vm0, %v2285_v33 }
  0x85   : > { %2175 = vmatprep.mubr.msk.bf16.mxu0 %vm524_vm0, %v2286_v34 }
  0x8c   : > { %2176 = vmatmul.mubr.msk.bf16.gmra.mrb[60].mxu0 %vm524_vm0, %v2287_v35 }
  0xe7   : > { %v2117_v37 = vpop.f32.mrb[0].mxu0 }
  0xe8   : > { %v664_v38 = vadd.f32 %v2117_v37, %v2433_v36  ;;  %v655_v39 = vpop.f32.mrb[1].mxu0 }
  0xe9   : > { %v656_v40 = vadd.f32 %v2433_v36, %v655_v39  ;;  %v2118_v41 = vpop.f32.mrb[2].mxu0 }
  0xea   : > { %v667_v42 = vadd.f32 %v2118_v41, %v2433_v36  ;;  %v658_v43 = vpop.f32.mrb[3].mxu0  ;;  %v912_v45 = vmax.f32 %v664_v38, 0.0 }
  0xeb   : > { %v659_v44 = vadd.f32 %v2433_v36, %v658_v43  ;;  %v910_v47 = vmax.f32 %v656_v40, 0.0 }
  0xec   : > { %v913_v46 = vmax.f32 %v667_v42, 0.0 }
  0xed   : > { %v911_v48 = vmax.f32 %v659_v44, 0.0 }
  0xee   : > { %v975_v49 = vpack.c.bf16 %v913_v46, %v912_v45 }
  0xef   : > { %v2121_v50 = vpop.f32.mrb[4].mxu0  ;;  %v974_v51 = vpack.c.bf16 %v911_v48, %v910_v47 }
  0xf0   : > { %v680_v52 = vadd.f32 %v2121_v50, %v2433_v36  ;;  %v671_v53 = vpop.f32.mrb[5].mxu0 }
  0xf1   : > { %v672_v54 = vadd.f32 %v2433_v36, %v671_v53  ;;  %v2122_v55 = vpop.f32.mrb[6].mxu0  ;;  %2183 = vmatprep.mubr.msk.bf16.mxu1 %vm1029_vm1, %v974_v51 }
  0xf2   : > { %v683_v56 = vadd.f32 %v2122_v55, %v2433_v36  ;;  %v674_v57 = vpop.f32.mrb[7].mxu0  ;;  %2184 = vmatmul.mubr.msk.bf16.vlgmr.msra.gmra.mrb[0].mxu1 %vm1029_vm1, %v975_v49  ;;  %v916_v59 = vmax.f32 %v680_v52, 0.0 }
  0xf3   : > { %v675_v58 = vadd.f32 %v2433_v36, %v674_v57  ;;  %v914_v61 = vmax.f32 %v672_v54, 0.0 }
  0xf4   : > { %v917_v60 = vmax.f32 %v683_v56, 0.0 }
  0xf5   : > { %v915_v62 = vmax.f32 %v675_v58, 0.0 }
  0xf6   : > { %v977_v63 = vpack.c.bf16 %v917_v60, %v916_v59 }
  0xf7   : > { %v976_v0 = vpack.c.bf16 %v915_v62, %v914_v61  ;;  %v2125_v1 = vpop.f32.mrb[8].mxu0 }
  0xf8   : > { %v696_v2 = vadd.f32 %v2125_v1, %v2433_v36  ;;  %v687_v3 = vpop.f32.mrb[9].mxu0 }
  0xf9   : > { %v688_v4 = vadd.f32 %v2433_v36, %v687_v3  ;;  %v2126_v5 = vpop.f32.mrb[10].mxu0  ;;  %2187 = vmatprep.mubr.msk.bf16.mxu1 %vm1029_vm1, %v976_v0 }
  0xfa   : > { %v699_v6 = vadd.f32 %v2126_v5, %v2433_v36  ;;  %v690_v7 = vpop.f32.mrb[11].mxu0  ;;  %2188 = vmatmul.mubr.msk.bf16.gmra.mrb[4].mxu1 %vm1029_vm1, %v977_v63  ;;  %v920_v9 = vmax.f32 %v696_v2, 0.0 }
  0xfb   : > { %v691_v8 = vadd.f32 %v2433_v36, %v690_v7  ;;  %v918_v11 = vmax.f32 %v688_v4, 0.0 }
  0xfc   : > { %v921_v10 = vmax.f32 %v699_v6, 0.0 }
  0xfd   : > { %v919_v12 = vmax.f32 %v691_v8, 0.0 }
  0xfe   : > { %v979_v13 = vpack.c.bf16 %v921_v10, %v920_v9 }
  0xff   : > { %v978_v14 = vpack.c.bf16 %v919_v12, %v918_v11  ;;  %v2129_v15 = vpop.f32.mrb[12].mxu0 }
 0x100   : > { %v712_v16 = vadd.f32 %v2129_v15, %v2433_v36  ;;  %v703_v17 = vpop.f32.mrb[13].mxu0 }
 0x101   : > { %v704_v18 = vadd.f32 %v2433_v36, %v703_v17  ;;  %v2130_v19 = vpop.f32.mrb[14].mxu0  ;;  %2191 = vmatprep.mubr.msk.bf16.mxu1 %vm1029_vm1, %v978_v14 }
 0x102   : > { %v715_v20 = vadd.f32 %v2130_v19, %v2433_v36  ;;  %v706_v21 = vpop.f32.mrb[15].mxu0  ;;  %2192 = vmatmul.mubr.msk.bf16.gmra.mrb[8].mxu1 %vm1029_vm1, %v979_v13  ;;  %v924_v23 = vmax.f32 %v712_v16, 0.0 }
 0x103   : > { %v707_v22 = vadd.f32 %v2433_v36, %v706_v21  ;;  %v922_v25 = vmax.f32 %v704_v18, 0.0 }
 0x104   : > { %v925_v24 = vmax.f32 %v715_v20, 0.0 }
 0x105   : > { %v923_v26 = vmax.f32 %v707_v22, 0.0 }
 0x106   : > { %v981_v27 = vpack.c.bf16 %v925_v24, %v924_v23 }
 0x107   : > { %v980_v28 = vpack.c.bf16 %v923_v26, %v922_v25  ;;  %v2133_v29 = vpop.f32.mrb[16].mxu0 }
 0x108   : > { %v728_v30 = vadd.f32 %v2133_v29, %v2433_v36  ;;  %v719_v31 = vpop.f32.mrb[17].mxu0 }
 0x109   : > { %v720_v32 = vadd.f32 %v2433_v36, %v719_v31  ;;  %v2134_v33 = vpop.f32.mrb[18].mxu0  ;;  %2195 = vmatprep.mubr.msk.bf16.mxu1 %vm1029_vm1, %v980_v28 }
 0x10a   : > { %v731_v34 = vadd.f32 %v2134_v33, %v2433_v36  ;;  %v722_v35 = vpop.f32.mrb[19].mxu0  ;;  %2196 = vmatmul.mubr.msk.bf16.gmra.mrb[12].mxu1 %vm1029_vm1, %v981_v27  ;;  %v928_v38 = vmax.f32 %v728_v30, 0.0 }
 0x10b   : > { %v723_v37 = vadd.f32 %v2433_v36, %v722_v35  ;;  %v926_v40 = vmax.f32 %v720_v32, 0.0 }
 0x10c   : > { %v929_v39 = vmax.f32 %v731_v34, 0.0 }
 0x10d   : > { %v927_v41 = vmax.f32 %v723_v37, 0.0 }
 0x10e   : > { %v983_v42 = vpack.c.bf16 %v929_v39, %v928_v38 }
 0x10f   : > { %v982_v43 = vpack.c.bf16 %v927_v41, %v926_v40  ;;  %v2137_v44 = vpop.f32.mrb[20].mxu0 }
 0x110   : > { %v744_v45 = vadd.f32 %v2137_v44, %v2433_v36  ;;  %v735_v46 = vpop.f32.mrb[21].mxu0 }
 0x111   : > { %v736_v47 = vadd.f32 %v2433_v36, %v735_v46  ;;  %v2138_v48 = vpop.f32.mrb[22].mxu0  ;;  %2199 = vmatprep.mubr.msk.bf16.mxu1 %vm1029_vm1, %v982_v43 }
 0x112   : > { %v747_v49 = vadd.f32 %v2138_v48, %v2433_v36  ;;  %v738_v50 = vpop.f32.mrb[23].mxu0  ;;  %2200 = vmatmul.mubr.msk.bf16.gmra.mrb[16].mxu1 %vm1029_vm1, %v983_v42  ;;  %v932_v52 = vmax.f32 %v744_v45, 0.0 }
 0x113   : > { %v739_v51 = vadd.f32 %v2433_v36, %v738_v50  ;;  %v930_v54 = vmax.f32 %v736_v47, 0.0 }
 0x114   : > { %v933_v53 = vmax.f32 %v747_v49, 0.0 }
 0x115   : > { %v931_v55 = vmax.f32 %v739_v51, 0.0 }
 0x116   : > { %v985_v56 = vpack.c.bf16 %v933_v53, %v932_v52 }
 0x117   : > { %v984_v57 = vpack.c.bf16 %v931_v55, %v930_v54  ;;  %v2141_v58 = vpop.f32.mrb[24].mxu0 }
 0x118   : > { %v760_v59 = vadd.f32 %v2141_v58, %v2433_v36  ;;  %v751_v60 = vpop.f32.mrb[25].mxu0 }
 0x119   : > { %v752_v61 = vadd.f32 %v2433_v36, %v751_v60  ;;  %v2142_v62 = vpop.f32.mrb[26].mxu0  ;;  %2203 = vmatprep.mubr.msk.bf16.mxu1 %vm1029_vm1, %v984_v57 }
 0x11a   : > { %v763_v63 = vadd.f32 %v2142_v62, %v2433_v36  ;;  %v754_v0 = vpop.f32.mrb[27].mxu0  ;;  %2204 = vmatmul.mubr.msk.bf16.gmra.mrb[20].mxu1 %vm1029_vm1, %v985_v56  ;;  %v936_v2 = vmax.f32 %v760_v59, 0.0 }
 0x11b   : > { %v755_v1 = vadd.f32 %v2433_v36, %v754_v0  ;;  %v934_v4 = vmax.f32 %v752_v61, 0.0 }
 0x11c   : > { %v937_v3 = vmax.f32 %v763_v63, 0.0 }
 0x11d   : > { %v935_v5 = vmax.f32 %v755_v1, 0.0 }
 0x11e   : > { %v987_v6 = vpack.c.bf16 %v937_v3, %v936_v2 }
 0x11f   : > { %v986_v7 = vpack.c.bf16 %v935_v5, %v934_v4  ;;  %v2145_v8 = vpop.f32.mrb[28].mxu0 }
 0x120   : > { %v776_v9 = vadd.f32 %v2145_v8, %v2433_v36  ;;  %v767_v10 = vpop.f32.mrb[29].mxu0 }
 0x121   : > { %v768_v11 = vadd.f32 %v2433_v36, %v767_v10  ;;  %v2146_v12 = vpop.f32.mrb[30].mxu0  ;;  %2207 = vmatprep.mubr.msk.bf16.mxu1 %vm1029_vm1, %v986_v7 }
 0x122   : > { %v779_v13 = vadd.f32 %v2146_v12, %v2433_v36  ;;  %v770_v14 = vpop.f32.mrb[31].mxu0  ;;  %2208 = vmatmul.mubr.msk.bf16.gmra.mrb[24].mxu1 %vm1029_vm1, %v987_v6  ;;  %v940_v16 = vmax.f32 %v776_v9, 0.0 }
 0x123   : > { %v771_v15 = vadd.f32 %v2433_v36, %v770_v14  ;;  %v938_v18 = vmax.f32 %v768_v11, 0.0 }
 0x124   : > { %v941_v17 = vmax.f32 %v779_v13, 0.0 }
 0x125   : > { %v939_v19 = vmax.f32 %v771_v15, 0.0 }
 0x126   : > { %v989_v20 = vpack.c.bf16 %v941_v17, %v940_v16 }
 0x127   : > { %v988_v21 = vpack.c.bf16 %v939_v19, %v938_v18  ;;  %v2149_v22 = vpop.f32.mrb[32].mxu0 }
 0x128   : > { %v792_v23 = vadd.f32 %v2149_v22, %v2433_v36  ;;  %v783_v24 = vpop.f32.mrb[33].mxu0 }
 0x129   : > { %v784_v25 = vadd.f32 %v2433_v36, %v783_v24  ;;  %v2150_v26 = vpop.f32.mrb[34].mxu0  ;;  %2211 = vmatprep.mubr.msk.bf16.mxu1 %vm1029_vm1, %v988_v21 }
 0x12a   : > { %v795_v27 = vadd.f32 %v2150_v26, %v2433_v36  ;;  %v786_v28 = vpop.f32.mrb[35].mxu0  ;;  %2212 = vmatmul.mubr.msk.bf16.gmra.mrb[28].mxu1 %vm1029_vm1, %v989_v20  ;;  %v944_v30 = vmax.f32 %v792_v23, 0.0 }
 0x12b   : > { %v787_v29 = vadd.f32 %v2433_v36, %v786_v28  ;;  %v942_v32 = vmax.f32 %v784_v25, 0.0 }
 0x12c   : > { %v945_v31 = vmax.f32 %v795_v27, 0.0 }
 0x12d   : > { %v943_v33 = vmax.f32 %v787_v29, 0.0 }
 0x12e   : > { %v991_v34 = vpack.c.bf16 %v945_v31, %v944_v30 }
 0x12f   : > { %v990_v35 = vpack.c.bf16 %v943_v33, %v942_v32  ;;  %v2153_v37 = vpop.f32.mrb[36].mxu0 }
 0x130   : > { %v808_v38 = vadd.f32 %v2153_v37, %v2433_v36  ;;  %v799_v39 = vpop.f32.mrb[37].mxu0 }
 0x131   : > { %v800_v40 = vadd.f32 %v2433_v36, %v799_v39  ;;  %v2154_v41 = vpop.f32.mrb[38].mxu0  ;;  %2215 = vmatprep.mubr.msk.bf16.mxu1 %vm1029_vm1, %v990_v35 }
 0x132   : > { %v811_v42 = vadd.f32 %v2154_v41, %v2433_v36  ;;  %v802_v43 = vpop.f32.mrb[39].mxu0  ;;  %2216 = vmatmul.mubr.msk.bf16.gmra.mrb[32].mxu1 %vm1029_vm1, %v991_v34  ;;  %v948_v45 = vmax.f32 %v808_v38, 0.0 }
 0x133   : > { %v803_v44 = vadd.f32 %v2433_v36, %v802_v43  ;;  %v946_v47 = vmax.f32 %v800_v40, 0.0 }
 0x134   : > { %v949_v46 = vmax.f32 %v811_v42, 0.0 }
 0x135   : > { %v947_v48 = vmax.f32 %v803_v44, 0.0 }
 0x136   : > { %v993_v49 = vpack.c.bf16 %v949_v46, %v948_v45 }
 0x137   : > { %v992_v50 = vpack.c.bf16 %v947_v48, %v946_v47  ;;  %v2157_v51 = vpop.f32.mrb[40].mxu0 }
 0x138   : > { %v824_v52 = vadd.f32 %v2157_v51, %v2433_v36  ;;  %v815_v53 = vpop.f32.mrb[41].mxu0 }
 0x139   : > { %v816_v54 = vadd.f32 %v2433_v36, %v815_v53  ;;  %v2158_v55 = vpop.f32.mrb[42].mxu0  ;;  %2219 = vmatprep.mubr.msk.bf16.mxu1 %vm1029_vm1, %v992_v50 }
 0x13a   : > { %v827_v56 = vadd.f32 %v2158_v55, %v2433_v36  ;;  %v818_v57 = vpop.f32.mrb[43].mxu0  ;;  %2220 = vmatmul.mubr.msk.bf16.gmra.mrb[36].mxu1 %vm1029_vm1, %v993_v49  ;;  %v952_v59 = vmax.f32 %v824_v52, 0.0 }
 0x13b   : > { %v819_v58 = vadd.f32 %v2433_v36, %v818_v57  ;;  %v950_v61 = vmax.f32 %v816_v54, 0.0 }
 0x13c   : > { %v953_v60 = vmax.f32 %v827_v56, 0.0 }
 0x13d   : > { %v951_v62 = vmax.f32 %v819_v58, 0.0 }
 0x13e   : > { %v995_v63 = vpack.c.bf16 %v953_v60, %v952_v59 }
 0x13f   : > { %v994_v0 = vpack.c.bf16 %v951_v62, %v950_v61  ;;  %v2161_v1 = vpop.f32.mrb[44].mxu0 }
 0x140   : > { %v840_v2 = vadd.f32 %v2161_v1, %v2433_v36  ;;  %v831_v3 = vpop.f32.mrb[45].mxu0 }
 0x141   : > { %v832_v4 = vadd.f32 %v2433_v36, %v831_v3  ;;  %v2162_v5 = vpop.f32.mrb[46].mxu0  ;;  %2223 = vmatprep.mubr.msk.bf16.mxu1 %vm1029_vm1, %v994_v0 }
 0x142   : > { %v843_v6 = vadd.f32 %v2162_v5, %v2433_v36  ;;  %v834_v7 = vpop.f32.mrb[47].mxu0  ;;  %2224 = vmatmul.mubr.msk.bf16.gmra.mrb[40].mxu1 %vm1029_vm1, %v995_v63  ;;  %v956_v9 = vmax.f32 %v840_v2, 0.0 }
 0x143   : > { %v835_v8 = vadd.f32 %v2433_v36, %v834_v7  ;;  %v954_v11 = vmax.f32 %v832_v4, 0.0 }
 0x144   : > { %v957_v10 = vmax.f32 %v843_v6, 0.0 }
 0x145   : > { %v955_v12 = vmax.f32 %v835_v8, 0.0  ;;  %v1481_v8 = vlaneseq }
 0x146   : > { %v997_v13 = vpack.c.bf16 %v957_v10, %v956_v9  ;;  %v1479_v10 = vld [vmem:[%s2941_s5] sm:$0x1] }
 0x147   : > { %v996_v14 = vpack.c.bf16 %v955_v12, %v954_v11  ;;  %v2165_v15 = vpop.f32.mrb[48].mxu0  ;;  %v1482_v9 = vshrl.u32 %v1481_v8, 7  ;;  %v1480_v11 = vunpack.c.l.bf16 %v1479_v10 }
 0x148   : > { %v856_v16 = vadd.f32 %v2165_v15, %v2433_v36  ;;  %v847_v17 = vpop.f32.mrb[49].mxu0 }
 0x149   : > { %v848_v18 = vadd.f32 %v2433_v36, %v847_v17  ;;  %v2166_v19 = vpop.f32.mrb[50].mxu0  ;;  %2227 = vmatprep.mubr.msk.bf16.mxu1 %vm1029_vm1, %v996_v14  ;;  %v1483_v12 = vsub.s32 0, %v1482_v9 }
 0x14a   : > { %v859_v20 = vadd.f32 %v2166_v19, %v2433_v36  ;;  %v850_v21 = vpop.f32.mrb[51].mxu0  ;;  %2228 = vmatmul.mubr.msk.bf16.gmra.mrb[44].mxu1 %vm1029_vm1, %v997_v13  ;;  %v960_v23 = vmax.f32 %v856_v16, 0.0 }
 0x14b   : > { %v851_v22 = vadd.f32 %v2433_v36, %v850_v21  ;;  %v958_v25 = vmax.f32 %v848_v18, 0.0  ;;  %v2540_v16 = vrot.slane %v1480_v11, %v1483_v12 }
 0x14c   : > { %v961_v24 = vmax.f32 %v859_v20, 0.0 }
 0x14d   : > { %v959_v26 = vmax.f32 %v851_v22, 0.0 }
 0x14e   : > { %v999_v27 = vpack.c.bf16 %v961_v24, %v960_v23 }
 0x14f   : > { %v998_v28 = vpack.c.bf16 %v959_v26, %v958_v25  ;;  %v2169_v29 = vpop.f32.mrb[52].mxu0 }
 0x150   : > { %v872_v30 = vadd.f32 %v2169_v29, %v2433_v36  ;;  %v863_v31 = vpop.f32.mrb[53].mxu0 }
 0x151   : > { %v864_v32 = vadd.f32 %v2433_v36, %v863_v31  ;;  %v2170_v33 = vpop.f32.mrb[54].mxu0  ;;  %2231 = vmatprep.mubr.msk.bf16.mxu1 %vm1029_vm1, %v998_v28 }
 0x152   : > { %v875_v34 = vadd.f32 %v2170_v33, %v2433_v36  ;;  %v866_v35 = vpop.f32.mrb[55].mxu0  ;;  %2232 = vmatmul.mubr.msk.bf16.gmra.mrb[48].mxu1 %vm1029_vm1, %v999_v27  ;;  %v964_v38 = vmax.f32 %v872_v30, 0.0 }
 0x153   : > { %v867_v37 = vadd.f32 %v2433_v36, %v866_v35  ;;  %v962_v40 = vmax.f32 %v864_v32, 0.0 }
 0x154   : > { %v965_v39 = vmax.f32 %v875_v34, 0.0 }
 0x155   : > { %v963_v41 = vmax.f32 %v867_v37, 0.0 }
 0x156   : > { %v1001_v42 = vpack.c.bf16 %v965_v39, %v964_v38 }
 0x157   : > { %v1000_v43 = vpack.c.bf16 %v963_v41, %v962_v40  ;;  %v2173_v44 = vpop.f32.mrb[56].mxu0 }
 0x158   : > { %v888_v45 = vadd.f32 %v2173_v44, %v2433_v36  ;;  %v879_v46 = vpop.f32.mrb[57].mxu0 }
 0x159   : > { %v880_v47 = vadd.f32 %v2433_v36, %v879_v46  ;;  %v2174_v48 = vpop.f32.mrb[58].mxu0  ;;  %2235 = vmatprep.mubr.msk.bf16.mxu1 %vm1029_vm1, %v1000_v43 }
 0x15a   : > { %v891_v49 = vadd.f32 %v2174_v48, %v2433_v36  ;;  %v882_v50 = vpop.f32.mrb[59].mxu0  ;;  %2236 = vmatmul.mubr.msk.bf16.gmra.mrb[52].mxu1 %vm1029_vm1, %v1001_v42  ;;  %v968_v52 = vmax.f32 %v888_v45, 0.0 }
 0x15b   : > { %v883_v51 = vadd.f32 %v2433_v36, %v882_v50  ;;  %v966_v54 = vmax.f32 %v880_v47, 0.0 }
 0x15c   : > { %v969_v53 = vmax.f32 %v891_v49, 0.0 }
 0x15d   : > { %v967_v55 = vmax.f32 %v883_v51, 0.0 }
 0x15e   : > { %v1003_v56 = vpack.c.bf16 %v969_v53, %v968_v52 }
 0x15f   : > { %v1002_v57 = vpack.c.bf16 %v967_v55, %v966_v54  ;;  %v2177_v58 = vpop.f32.mrb[60].mxu0 }
 0x160   : > { %v904_v59 = vadd.f32 %v2177_v58, %v2433_v36  ;;  %v895_v60 = vpop.f32.mrb[61].mxu0 }
 0x161   : > { %v896_v61 = vadd.f32 %v2433_v36, %v895_v60  ;;  %v2178_v62 = vpop.f32.mrb[62].mxu0  ;;  %2239 = vmatprep.mubr.msk.bf16.mxu1 %vm1029_vm1, %v1002_v57 }
 0x162   : > { %v907_v63 = vadd.f32 %v2178_v62, %v2433_v36  ;;  %v898_v0 = vpop.f32.mrb[63].mxu0  ;;  %2240 = vmatmul.mubr.msk.bf16.gmra.mrb[56].mxu1 %vm1029_vm1, %v1003_v56  ;;  %v972_v2 = vmax.f32 %v904_v59, 0.0 }
 0x163   : > { %v899_v1 = vadd.f32 %v2433_v36, %v898_v0  ;;  %v970_v4 = vmax.f32 %v896_v61, 0.0  ;;  %v2537_v36 = vld [vmem:[%s2940_s4] ss:$0 sm:$0xff] }
 0x164   : > { %v973_v3 = vmax.f32 %v907_v63, 0.0 }
 0x165   : > { %v971_v5 = vmax.f32 %v899_v1, 0.0 }
 0x166   : > { %v1005_v6 = vpack.c.bf16 %v973_v3, %v972_v2 }
 0x167   : > { %v1004_v7 = vpack.c.bf16 %v971_v5, %v970_v4 }
 0x169   : > { %2243 = vmatprep.mubr.msk.bf16.mxu1 %vm1029_vm1, %v1004_v7 }
 0x16a   : > { %2244 = vmatmul.mubr.msk.bf16.gmra.mrb[60].mxu1 %vm1029_vm1, %v1005_v6 }
 0x1c5   : > { %v2185_v13 = vpop.f32.mrb[0].mxu1 }
 0x1c6   : > { %v1169_v14 = vadd.f32 %v2185_v13, %v2537_v36  ;;  %v1160_v15 = vpop.f32.mrb[1].mxu1 }
 0x1c7   : > { %v1161_v17 = vadd.f32 %v2537_v36, %v1160_v15  ;;  %v2186_v18 = vpop.f32.mrb[2].mxu1 }
 0x1c8   : > { %v1417_v19 = vmax.f32 %v1169_v14, 0.0  ;;  %v1172_v20 = vadd.f32 %v2186_v18, %v2537_v36  ;;  %v1163_v21 = vpop.f32.mrb[3].mxu1 }
 0x1c9   : > { %v1415_v22 = vmax.f32 %v1161_v17, 0.0  ;;  %v1164_v23 = vadd.f32 %v2537_v36, %v1163_v21 }
 0x1ca   : > { %v1418_v24 = vmax.f32 %v1172_v20, 0.0  ;;  %v1487_v25 = vmul.f32 %v2540_v16, %v1417_v19 }
 0x1cb   : > { %v1416_v26 = vmax.f32 %v1164_v23, 0.0  ;;  %v1485_v27 = vmul.f32 %v2540_v16, %v1415_v22 }
 0x1cc   : > { %v1555_v28 = vsel %vm1029_vm1, %v1487_v25, 0.0  ;;  %v1488_v29 = vmul.f32 %v2540_v16, %v1418_v24 }
 0x1cd   : > { %1556 = vadd.xlane.f32.xlu1 %v1555_v28  ;;  %v2189_v30 = vpop.f32.mrb[4].mxu1  ;;  %v1549_v31 = vsel %vm1029_vm1, %v1485_v27, 0.0  ;;  %v1486_v32 = vmul.f32 %v2540_v16, %v1416_v26 }
 0x1ce   : > { %v1185_v33 = vadd.f32 %v2189_v30, %v2537_v36  ;;  %v1176_v34 = vpop.f32.mrb[5].mxu1  ;;  %1550 = vadd.xlane.f32.xlu0 %v1549_v31  ;;  %v1558_v41 = vsel %vm1029_vm1, %v1488_v29, 0.0 }
 0x1cf   : > { %v1177_v35 = vadd.f32 %v2537_v36, %v1176_v34  ;;  %v2190_v37 = vpop.f32.mrb[6].mxu1  ;;  %v1552_v44 = vsel %vm1029_vm1, %v1486_v32, 0.0 }
 0x1d0   : > { %v1421_v38 = vmax.f32 %v1185_v33, 0.0  ;;  %v1188_v39 = vadd.f32 %v2190_v37, %v2537_v36  ;;  %v1179_v40 = vpop.f32.mrb[7].mxu1 }
 0x1d1   : > { %v1419_v42 = vmax.f32 %v1177_v35, 0.0  ;;  %v1180_v43 = vadd.f32 %v2537_v36, %v1179_v40  ;;  %1559 = vadd.xlane.f32.xlu1 %v1558_v41 }
 0x1d2   : > { %v1422_v45 = vmax.f32 %v1188_v39, 0.0  ;;  %1553 = vadd.xlane.f32.xlu0 %v1552_v44  ;;  %v1491_v46 = vmul.f32 %v2540_v16, %v1421_v38 }
 0x1d3   : > { %v1420_v47 = vmax.f32 %v1180_v43, 0.0  ;;  %v1489_v51 = vmul.f32 %v2540_v16, %v1419_v42 }
 0x1d4   : > { %v1567_v48 = vsel %vm1029_vm1, %v1491_v46, 0.0  ;;  %v1492_v49 = vmul.f32 %v2540_v16, %v1422_v45 }
 0x1d5   : > { %v2193_v50 = vpop.f32.mrb[8].mxu1  ;;  %v1490_v55 = vmul.f32 %v2540_v16, %v1420_v47  ;;  %v1561_v63 = vsel %vm1029_vm1, %v1489_v51, 0.0 }
 0x1d6   : > { %v1201_v52 = vadd.f32 %v2193_v50, %v2537_v36  ;;  %v1192_v53 = vpop.f32.mrb[9].mxu1  ;;  %1568 = vadd.xlane.f32.xlu0 %v1567_v48  ;;  %v1570_v54 = vsel %vm1029_vm1, %v1492_v49, 0.0 }
 0x1d7   : > { %v1193_v56 = vadd.f32 %v2537_v36, %v1192_v53  ;;  %1571 = vadd.xlane.f32.xlu1 %v1570_v54  ;;  %v2194_v57 = vpop.f32.mrb[10].mxu1  ;;  %v1564_v1 = vsel %vm1029_vm1, %v1490_v55, 0.0 }
 0x1d8   : > { %v1425_v58 = vmax.f32 %v1201_v52, 0.0  ;;  %v1204_v59 = vadd.f32 %v2194_v57, %v2537_v36  ;;  %v1195_v60 = vpop.f32.mrb[11].mxu1 }
 0x1d9   : > { %v1423_v61 = vmax.f32 %v1193_v56, 0.0  ;;  %v1196_v62 = vadd.f32 %v2537_v36, %v1195_v60 }
 0x1da   : > { %v1426_v0 = vmax.f32 %v1204_v59, 0.0  ;;  %1562 = vadd.xlane.f32.xlu0 %v1561_v63  ;;  %v1495_v2 = vmul.f32 %v2540_v16, %v1425_v58 }
 0x1db   : > { %v1424_v3 = vmax.f32 %v1196_v62, 0.0  ;;  %1565 = vadd.xlane.f32.xlu1 %v1564_v1  ;;  %v1493_v7 = vmul.f32 %v2540_v16, %v1423_v61 }
 0x1dc   : > { %v1579_v4 = vsel %vm1029_vm1, %v1495_v2, 0.0  ;;  %v1496_v5 = vmul.f32 %v2540_v16, %v1426_v0 }
 0x1dd   : > { %v2197_v6 = vpop.f32.mrb[12].mxu1  ;;  %v1494_v11 = vmul.f32 %v2540_v16, %v1424_v3  ;;  %v1573_v20 = vsel %vm1029_vm1, %v1493_v7, 0.0 }
 0x1de   : > { %v1217_v8 = vadd.f32 %v2197_v6, %v2537_v36  ;;  %v1208_v9 = vpop.f32.mrb[13].mxu1  ;;  %1580 = vadd.xlane.f32.xlu0 %v1579_v4  ;;  %v1582_v10 = vsel %vm1029_vm1, %v1496_v5, 0.0 }
 0x1df   : > { %v1209_v12 = vadd.f32 %v2537_v36, %v1208_v9  ;;  %v2198_v13 = vpop.f32.mrb[14].mxu1  ;;  %1583 = vadd.xlane.f32.xlu1 %v1582_v10  ;;  %v1576_v22 = vsel %vm1029_vm1, %v1494_v11, 0.0 }
 0x1e0   : > { %v1429_v14 = vmax.f32 %v1217_v8, 0.0  ;;  %v1220_v15 = vadd.f32 %v2198_v13, %v2537_v36  ;;  %v1211_v17 = vpop.f32.mrb[15].mxu1 }
 0x1e1   : > { %v1427_v18 = vmax.f32 %v1209_v12, 0.0  ;;  %v1212_v19 = vadd.f32 %v2537_v36, %v1211_v17 }
 0x1e2   : > { %v1430_v21 = vmax.f32 %v1220_v15, 0.0  ;;  %1574 = vadd.xlane.f32.xlu0 %v1573_v20  ;;  %v1499_v23 = vmul.f32 %v2540_v16, %v1429_v14 }
 0x1e3   : > { %v1428_v24 = vmax.f32 %v1212_v19, 0.0  ;;  %1577 = vadd.xlane.f32.xlu1 %v1576_v22  ;;  %v1497_v28 = vmul.f32 %v2540_v16, %v1427_v18 }
 0x1e4   : > { %v1591_v25 = vsel %vm1029_vm1, %v1499_v23, 0.0  ;;  %v1500_v26 = vmul.f32 %v2540_v16, %v1430_v21 }
 0x1e5   : > { %v2201_v27 = vpop.f32.mrb[16].mxu1  ;;  %v1498_v32 = vmul.f32 %v2540_v16, %v1428_v24  ;;  %v1585_v41 = vsel %vm1029_vm1, %v1497_v28, 0.0 }
 0x1e6   : > { %v1233_v29 = vadd.f32 %v2201_v27, %v2537_v36  ;;  %v1224_v30 = vpop.f32.mrb[17].mxu1  ;;  %1592 = vadd.xlane.f32.xlu0 %v1591_v25  ;;  %v1594_v31 = vsel %vm1029_vm1, %v1500_v26, 0.0 }
 0x1e7   : > { %v1225_v33 = vadd.f32 %v2537_v36, %v1224_v30  ;;  %v2202_v34 = vpop.f32.mrb[18].mxu1  ;;  %1595 = vadd.xlane.f32.xlu1 %v1594_v31  ;;  %v1588_v43 = vsel %vm1029_vm1, %v1498_v32, 0.0 }
 0x1e8   : > { %v1433_v35 = vmax.f32 %v1233_v29, 0.0  ;;  %v1236_v37 = vadd.f32 %v2202_v34, %v2537_v36  ;;  %v1227_v38 = vpop.f32.mrb[19].mxu1 }
 0x1e9   : > { %v1431_v39 = vmax.f32 %v1225_v33, 0.0  ;;  %v1228_v40 = vadd.f32 %v2537_v36, %v1227_v38 }
 0x1ea   : > { %v1434_v42 = vmax.f32 %v1236_v37, 0.0  ;;  %1586 = vadd.xlane.f32.xlu0 %v1585_v41  ;;  %v1503_v44 = vmul.f32 %v2540_v16, %v1433_v35 }
 0x1eb   : > { %v1432_v45 = vmax.f32 %v1228_v40, 0.0  ;;  %1589 = vadd.xlane.f32.xlu1 %v1588_v43  ;;  %v1501_v49 = vmul.f32 %v2540_v16, %v1431_v39 }
 0x1ec   : > { %v1603_v46 = vsel %vm1029_vm1, %v1503_v44, 0.0  ;;  %v1504_v47 = vmul.f32 %v2540_v16, %v1434_v42 }
 0x1ed   : > { %v2205_v48 = vpop.f32.mrb[20].mxu1  ;;  %v1502_v53 = vmul.f32 %v2540_v16, %v1432_v45  ;;  %v1597_v61 = vsel %vm1029_vm1, %v1501_v49, 0.0 }
 0x1ee   : > { %v1249_v50 = vadd.f32 %v2205_v48, %v2537_v36  ;;  %v1240_v51 = vpop.f32.mrb[21].mxu1  ;;  %1604 = vadd.xlane.f32.xlu0 %v1603_v46  ;;  %v1606_v52 = vsel %vm1029_vm1, %v1504_v47, 0.0 }
 0x1ef   : > { %v1241_v54 = vadd.f32 %v2537_v36, %v1240_v51  ;;  %v2206_v55 = vpop.f32.mrb[22].mxu1  ;;  %1607 = vadd.xlane.f32.xlu1 %v1606_v52  ;;  %v1600_v63 = vsel %vm1029_vm1, %v1502_v53, 0.0 }
 0x1f0   : > { %v1437_v56 = vmax.f32 %v1249_v50, 0.0  ;;  %v1252_v57 = vadd.f32 %v2206_v55, %v2537_v36  ;;  %v1243_v58 = vpop.f32.mrb[23].mxu1 }
 0x1f1   : > { %v1435_v59 = vmax.f32 %v1241_v54, 0.0  ;;  %v1244_v60 = vadd.f32 %v2537_v36, %v1243_v58 }
 0x1f2   : > { %v1438_v62 = vmax.f32 %v1252_v57, 0.0  ;;  %1598 = vadd.xlane.f32.xlu0 %v1597_v61  ;;  %v1507_v0 = vmul.f32 %v2540_v16, %v1437_v56 }
 0x1f3   : > { %v1436_v1 = vmax.f32 %v1244_v60, 0.0  ;;  %1601 = vadd.xlane.f32.xlu1 %v1600_v63  ;;  %v1505_v5 = vmul.f32 %v2540_v16, %v1435_v59 }
 0x1f4   : > { %v1615_v2 = vsel %vm1029_vm1, %v1507_v0, 0.0  ;;  %v1508_v3 = vmul.f32 %v2540_v16, %v1438_v62 }
 0x1f5   : > { %v2209_v4 = vpop.f32.mrb[24].mxu1  ;;  %v1506_v9 = vmul.f32 %v2540_v16, %v1436_v1  ;;  %v1609_v18 = vsel %vm1029_vm1, %v1505_v5, 0.0 }
 0x1f6   : > { %v1265_v6 = vadd.f32 %v2209_v4, %v2537_v36  ;;  %v1256_v7 = vpop.f32.mrb[25].mxu1  ;;  %1616 = vadd.xlane.f32.xlu0 %v1615_v2  ;;  %v1618_v8 = vsel %vm1029_vm1, %v1508_v3, 0.0 }
 0x1f7   : > { %v1257_v10 = vadd.f32 %v2537_v36, %v1256_v7  ;;  %v2210_v11 = vpop.f32.mrb[26].mxu1  ;;  %1619 = vadd.xlane.f32.xlu1 %v1618_v8  ;;  %v1612_v20 = vsel %vm1029_vm1, %v1506_v9, 0.0 }
 0x1f8   : > { %v1441_v12 = vmax.f32 %v1265_v6, 0.0  ;;  %v1268_v13 = vadd.f32 %v2210_v11, %v2537_v36  ;;  %v1259_v14 = vpop.f32.mrb[27].mxu1 }
 0x1f9   : > { %v1439_v15 = vmax.f32 %v1257_v10, 0.0  ;;  %v1260_v17 = vadd.f32 %v2537_v36, %v1259_v14 }
 0x1fa   : > { %v1442_v19 = vmax.f32 %v1268_v13, 0.0  ;;  %1610 = vadd.xlane.f32.xlu0 %v1609_v18  ;;  %v1511_v21 = vmul.f32 %v2540_v16, %v1441_v12 }
 0x1fb   : > { %v1440_v22 = vmax.f32 %v1260_v17, 0.0  ;;  %1613 = vadd.xlane.f32.xlu1 %v1612_v20  ;;  %v1509_v26 = vmul.f32 %v2540_v16, %v1439_v15 }
 0x1fc   : > { %v1627_v23 = vsel %vm1029_vm1, %v1511_v21, 0.0  ;;  %v1512_v24 = vmul.f32 %v2540_v16, %v1442_v19 }
 0x1fd   : > { %v2213_v25 = vpop.f32.mrb[28].mxu1  ;;  %v1510_v30 = vmul.f32 %v2540_v16, %v1440_v22  ;;  %v1621_v39 = vsel %vm1029_vm1, %v1509_v26, 0.0 }
 0x1fe   : > { %v1281_v27 = vadd.f32 %v2213_v25, %v2537_v36  ;;  %v1272_v28 = vpop.f32.mrb[29].mxu1  ;;  %1628 = vadd.xlane.f32.xlu0 %v1627_v23  ;;  %v1630_v29 = vsel %vm1029_vm1, %v1512_v24, 0.0 }
 0x1ff   : > { %v1273_v31 = vadd.f32 %v2537_v36, %v1272_v28  ;;  %v2214_v32 = vpop.f32.mrb[30].mxu1  ;;  %1631 = vadd.xlane.f32.xlu1 %v1630_v29  ;;  %v1624_v41 = vsel %vm1029_vm1, %v1510_v30, 0.0 }
 0x200   : > { %v1445_v33 = vmax.f32 %v1281_v27, 0.0  ;;  %v1284_v34 = vadd.f32 %v2214_v32, %v2537_v36  ;;  %v1275_v35 = vpop.f32.mrb[31].mxu1 }
 0x201   : > { %v1443_v37 = vmax.f32 %v1273_v31, 0.0  ;;  %v1276_v38 = vadd.f32 %v2537_v36, %v1275_v35 }
 0x202   : > { %v1446_v40 = vmax.f32 %v1284_v34, 0.0  ;;  %1622 = vadd.xlane.f32.xlu0 %v1621_v39  ;;  %v1515_v42 = vmul.f32 %v2540_v16, %v1445_v33 }
 0x203   : > { %v1444_v43 = vmax.f32 %v1276_v38, 0.0  ;;  %1625 = vadd.xlane.f32.xlu1 %v1624_v41  ;;  %v1513_v47 = vmul.f32 %v2540_v16, %v1443_v37 }
 0x204   : > { %v1639_v44 = vsel %vm1029_vm1, %v1515_v42, 0.0  ;;  %v1516_v45 = vmul.f32 %v2540_v16, %v1446_v40 }
 0x205   : > { %v2217_v46 = vpop.f32.mrb[32].mxu1  ;;  %v1514_v51 = vmul.f32 %v2540_v16, %v1444_v43  ;;  %v1633_v59 = vsel %vm1029_vm1, %v1513_v47, 0.0 }
 0x206   : > { %v1297_v48 = vadd.f32 %v2217_v46, %v2537_v36  ;;  %v1288_v49 = vpop.f32.mrb[33].mxu1  ;;  %1640 = vadd.xlane.f32.xlu0 %v1639_v44  ;;  %v1642_v50 = vsel %vm1029_vm1, %v1516_v45, 0.0 }
 0x207   : > { %v1289_v52 = vadd.f32 %v2537_v36, %v1288_v49  ;;  %v2218_v53 = vpop.f32.mrb[34].mxu1  ;;  %1643 = vadd.xlane.f32.xlu1 %v1642_v50  ;;  %v1636_v61 = vsel %vm1029_vm1, %v1514_v51, 0.0 }
 0x208   : > { %v1449_v54 = vmax.f32 %v1297_v48, 0.0  ;;  %v1300_v55 = vadd.f32 %v2218_v53, %v2537_v36  ;;  %v1291_v56 = vpop.f32.mrb[35].mxu1 }
 0x209   : > { %v1447_v57 = vmax.f32 %v1289_v52, 0.0  ;;  %v1292_v58 = vadd.f32 %v2537_v36, %v1291_v56 }
 0x20a   : > { %v1450_v60 = vmax.f32 %v1300_v55, 0.0  ;;  %1634 = vadd.xlane.f32.xlu0 %v1633_v59  ;;  %v1519_v62 = vmul.f32 %v2540_v16, %v1449_v54 }
 0x20b   : > { %v1448_v63 = vmax.f32 %v1292_v58, 0.0  ;;  %1637 = vadd.xlane.f32.xlu1 %v1636_v61  ;;  %v1517_v3 = vmul.f32 %v2540_v16, %v1447_v57 }
 0x20c   : > { %v1651_v0 = vsel %vm1029_vm1, %v1519_v62, 0.0  ;;  %v1520_v1 = vmul.f32 %v2540_v16, %v1450_v60 }
 0x20d   : > { %v2221_v2 = vpop.f32.mrb[36].mxu1  ;;  %v1518_v7 = vmul.f32 %v2540_v16, %v1448_v63  ;;  %v1645_v15 = vsel %vm1029_vm1, %v1517_v3, 0.0 }
 0x20e   : > { %v1313_v4 = vadd.f32 %v2221_v2, %v2537_v36  ;;  %v1304_v5 = vpop.f32.mrb[37].mxu1  ;;  %1652 = vadd.xlane.f32.xlu0 %v1651_v0  ;;  %v1654_v6 = vsel %vm1029_vm1, %v1520_v1, 0.0 }
 0x20f   : > { %v1305_v8 = vadd.f32 %v2537_v36, %v1304_v5  ;;  %v2222_v9 = vpop.f32.mrb[38].mxu1  ;;  %1655 = vadd.xlane.f32.xlu1 %v1654_v6  ;;  %v1648_v18 = vsel %vm1029_vm1, %v1518_v7, 0.0 }
 0x210   : > { %v1453_v10 = vmax.f32 %v1313_v4, 0.0  ;;  %v1316_v11 = vadd.f32 %v2222_v9, %v2537_v36  ;;  %v1307_v12 = vpop.f32.mrb[39].mxu1 }
 0x211   : > { %v1451_v13 = vmax.f32 %v1305_v8, 0.0  ;;  %v1308_v14 = vadd.f32 %v2537_v36, %v1307_v12 }
 0x212   : > { %v1454_v17 = vmax.f32 %v1316_v11, 0.0  ;;  %1646 = vadd.xlane.f32.xlu0 %v1645_v15  ;;  %v1523_v19 = vmul.f32 %v2540_v16, %v1453_v10 }
 0x213   : > { %v1452_v20 = vmax.f32 %v1308_v14, 0.0  ;;  %1649 = vadd.xlane.f32.xlu1 %v1648_v18  ;;  %v1521_v24 = vmul.f32 %v2540_v16, %v1451_v13 }
 0x214   : > { %v1663_v21 = vsel %vm1029_vm1, %v1523_v19, 0.0  ;;  %v1524_v22 = vmul.f32 %v2540_v16, %v1454_v17 }
 0x215   : > { %v2225_v23 = vpop.f32.mrb[40].mxu1  ;;  %v1522_v28 = vmul.f32 %v2540_v16, %v1452_v20  ;;  %v1657_v37 = vsel %vm1029_vm1, %v1521_v24, 0.0 }
 0x216   : > { %v1329_v25 = vadd.f32 %v2225_v23, %v2537_v36  ;;  %v1320_v26 = vpop.f32.mrb[41].mxu1  ;;  %1664 = vadd.xlane.f32.xlu0 %v1663_v21  ;;  %v1666_v27 = vsel %vm1029_vm1, %v1524_v22, 0.0 }
 0x217   : > { %v1321_v29 = vadd.f32 %v2537_v36, %v1320_v26  ;;  %v2226_v30 = vpop.f32.mrb[42].mxu1  ;;  %1667 = vadd.xlane.f32.xlu1 %v1666_v27  ;;  %v1660_v39 = vsel %vm1029_vm1, %v1522_v28, 0.0 }
 0x218   : > { %v1457_v31 = vmax.f32 %v1329_v25, 0.0  ;;  %v1332_v32 = vadd.f32 %v2226_v30, %v2537_v36  ;;  %v1323_v33 = vpop.f32.mrb[43].mxu1 }
 0x219   : > { %v1455_v34 = vmax.f32 %v1321_v29, 0.0  ;;  %v1324_v35 = vadd.f32 %v2537_v36, %v1323_v33 }
 0x21a   : > { %v1458_v38 = vmax.f32 %v1332_v32, 0.0  ;;  %1658 = vadd.xlane.f32.xlu0 %v1657_v37  ;;  %v1527_v40 = vmul.f32 %v2540_v16, %v1457_v31 }
 0x21b   : > { %v1456_v41 = vmax.f32 %v1324_v35, 0.0  ;;  %1661 = vadd.xlane.f32.xlu1 %v1660_v39  ;;  %v1525_v45 = vmul.f32 %v2540_v16, %v1455_v34 }
 0x21c   : > { %v1675_v42 = vsel %vm1029_vm1, %v1527_v40, 0.0  ;;  %v1528_v43 = vmul.f32 %v2540_v16, %v1458_v38 }
 0x21d   : > { %v2229_v44 = vpop.f32.mrb[44].mxu1  ;;  %v1526_v49 = vmul.f32 %v2540_v16, %v1456_v41  ;;  %v1669_v57 = vsel %vm1029_vm1, %v1525_v45, 0.0 }
 0x21e   : > { %v1345_v46 = vadd.f32 %v2229_v44, %v2537_v36  ;;  %v1336_v47 = vpop.f32.mrb[45].mxu1  ;;  %1676 = vadd.xlane.f32.xlu0 %v1675_v42  ;;  %v1678_v48 = vsel %vm1029_vm1, %v1528_v43, 0.0 }
 0x21f   : > { %v1337_v50 = vadd.f32 %v2537_v36, %v1336_v47  ;;  %v2230_v51 = vpop.f32.mrb[46].mxu1  ;;  %1679 = vadd.xlane.f32.xlu1 %v1678_v48  ;;  %v1672_v59 = vsel %vm1029_vm1, %v1526_v49, 0.0 }
 0x220   : > { %v1461_v52 = vmax.f32 %v1345_v46, 0.0  ;;  %v1348_v53 = vadd.f32 %v2230_v51, %v2537_v36  ;;  %v1339_v54 = vpop.f32.mrb[47].mxu1 }
 0x221   : > { %v1459_v55 = vmax.f32 %v1337_v50, 0.0  ;;  %v1340_v56 = vadd.f32 %v2537_v36, %v1339_v54 }
 0x222   : > { %v1462_v58 = vmax.f32 %v1348_v53, 0.0  ;;  %1670 = vadd.xlane.f32.xlu0 %v1669_v57  ;;  %v1531_v60 = vmul.f32 %v2540_v16, %v1461_v52 }
 0x223   : > { %v1460_v61 = vmax.f32 %v1340_v56, 0.0  ;;  %1673 = vadd.xlane.f32.xlu1 %v1672_v59  ;;  %v1529_v1 = vmul.f32 %v2540_v16, %v1459_v55 }
 0x224   : > { %v1687_v62 = vsel %vm1029_vm1, %v1531_v60, 0.0  ;;  %v1532_v63 = vmul.f32 %v2540_v16, %v1462_v58 }
 0x225   : > { %v2233_v0 = vpop.f32.mrb[48].mxu1  ;;  %v1530_v5 = vmul.f32 %v2540_v16, %v1460_v61  ;;  %v1681_v13 = vsel %vm1029_vm1, %v1529_v1, 0.0 }
 0x226   : > { %v1361_v2 = vadd.f32 %v2233_v0, %v2537_v36  ;;  %v1352_v3 = vpop.f32.mrb[49].mxu1  ;;  %1688 = vadd.xlane.f32.xlu0 %v1687_v62  ;;  %v1690_v4 = vsel %vm1029_vm1, %v1532_v63, 0.0 }
 0x227   : > { %v1353_v6 = vadd.f32 %v2537_v36, %v1352_v3  ;;  %v2234_v7 = vpop.f32.mrb[50].mxu1  ;;  %1691 = vadd.xlane.f32.xlu1 %v1690_v4  ;;  %v1684_v15 = vsel %vm1029_vm1, %v1530_v5, 0.0 }
 0x228   : > { %v1465_v8 = vmax.f32 %v1361_v2, 0.0  ;;  %v1364_v9 = vadd.f32 %v2234_v7, %v2537_v36  ;;  %v1355_v10 = vpop.f32.mrb[51].mxu1 }
 0x229   : > { %v1463_v11 = vmax.f32 %v1353_v6, 0.0  ;;  %v1356_v12 = vadd.f32 %v2537_v36, %v1355_v10 }
 0x22a   : > { %v1466_v14 = vmax.f32 %v1364_v9, 0.0  ;;  %1682 = vadd.xlane.f32.xlu0 %v1681_v13  ;;  %v1535_v17 = vmul.f32 %v2540_v16, %v1465_v8 }
 0x22b   : > { %v1464_v18 = vmax.f32 %v1356_v12, 0.0  ;;  %1685 = vadd.xlane.f32.xlu1 %v1684_v15  ;;  %v1533_v22 = vmul.f32 %v2540_v16, %v1463_v11 }
 0x22c   : > { %v1699_v19 = vsel %vm1029_vm1, %v1535_v17, 0.0  ;;  %v1536_v20 = vmul.f32 %v2540_v16, %v1466_v14 }
 0x22d   : > { %v2237_v21 = vpop.f32.mrb[52].mxu1  ;;  %v1534_v26 = vmul.f32 %v2540_v16, %v1464_v18  ;;  %v1693_v34 = vsel %vm1029_vm1, %v1533_v22, 0.0 }
 0x22e   : > { %v1377_v23 = vadd.f32 %v2237_v21, %v2537_v36  ;;  %v1368_v24 = vpop.f32.mrb[53].mxu1  ;;  %1700 = vadd.xlane.f32.xlu0 %v1699_v19  ;;  %v1702_v25 = vsel %vm1029_vm1, %v1536_v20, 0.0 }
 0x22f   : > { %v1369_v27 = vadd.f32 %v2537_v36, %v1368_v24  ;;  %v2238_v28 = vpop.f32.mrb[54].mxu1  ;;  %1703 = vadd.xlane.f32.xlu1 %v1702_v25  ;;  %v1696_v37 = vsel %vm1029_vm1, %v1534_v26, 0.0 }
 0x230   : > { %v1469_v29 = vmax.f32 %v1377_v23, 0.0  ;;  %v1380_v30 = vadd.f32 %v2238_v28, %v2537_v36  ;;  %v1371_v31 = vpop.f32.mrb[55].mxu1  ;;  %v2734_v23 = vld [vmem:[#allocation2] ss:$0 sm:$0xff] }
 0x231   : > { %v1467_v32 = vmax.f32 %v1369_v27, 0.0  ;;  %v1372_v33 = vadd.f32 %v2537_v36, %v1371_v31 }
 0x232   : > { %v1470_v35 = vmax.f32 %v1380_v30, 0.0  ;;  %1694 = vadd.xlane.f32.xlu0 %v1693_v34  ;;  %v1539_v38 = vmul.f32 %v2540_v16, %v1469_v29 }
 0x233   : > { %v1468_v39 = vmax.f32 %v1372_v33, 0.0  ;;  %1697 = vadd.xlane.f32.xlu1 %v1696_v37  ;;  %v1537_v43 = vmul.f32 %v2540_v16, %v1467_v32 }
 0x234   : > { %v1711_v40 = vsel %vm1029_vm1, %v1539_v38, 0.0  ;;  %v1540_v41 = vmul.f32 %v2540_v16, %v1470_v35 }
 0x235   : > { %v2241_v42 = vpop.f32.mrb[56].mxu1  ;;  %v1538_v47 = vmul.f32 %v2540_v16, %v1468_v39  ;;  %v1705_v55 = vsel %vm1029_vm1, %v1537_v43, 0.0 }
 0x236   : > { %v1393_v44 = vadd.f32 %v2241_v42, %v2537_v36  ;;  %v1384_v45 = vpop.f32.mrb[57].mxu1  ;;  %1712 = vadd.xlane.f32.xlu0 %v1711_v40  ;;  %v1714_v46 = vsel %vm1029_vm1, %v1540_v41, 0.0 }
 0x237   : > { %v1385_v48 = vadd.f32 %v2537_v36, %v1384_v45  ;;  %v2242_v49 = vpop.f32.mrb[58].mxu1  ;;  %1715 = vadd.xlane.f32.xlu1 %v1714_v46  ;;  %v1708_v57 = vsel %vm1029_vm1, %v1538_v47, 0.0 }
 0x238   : > { %v1473_v50 = vmax.f32 %v1393_v44, 0.0  ;;  %v1396_v51 = vadd.f32 %v2242_v49, %v2537_v36  ;;  %v1387_v52 = vpop.f32.mrb[59].mxu1 }
 0x239   : > { %v1471_v53 = vmax.f32 %v1385_v48, 0.0  ;;  %v1388_v54 = vadd.f32 %v2537_v36, %v1387_v52 }
 0x23a   : > { %v1474_v56 = vmax.f32 %v1396_v51, 0.0  ;;  %1706 = vadd.xlane.f32.xlu0 %v1705_v55  ;;  %v1543_v58 = vmul.f32 %v2540_v16, %v1473_v50 }
 0x23b   : > { %v1472_v59 = vmax.f32 %v1388_v54, 0.0  ;;  %1709 = vadd.xlane.f32.xlu1 %v1708_v57  ;;  %v1541_v63 = vmul.f32 %v2540_v16, %v1471_v53 }
 0x23c   : > { %v1723_v60 = vsel %vm1029_vm1, %v1543_v58, 0.0  ;;  %v1544_v61 = vmul.f32 %v2540_v16, %v1474_v56 }
 0x23d   : > { %v2245_v62 = vpop.f32.mrb[60].mxu1  ;;  %v1542_v3 = vmul.f32 %v2540_v16, %v1472_v59  ;;  %v1717_v11 = vsel %vm1029_vm1, %v1541_v63, 0.0 }
 0x23e   : > { %v1409_v0 = vadd.f32 %v2245_v62, %v2537_v36  ;;  %v1400_v1 = vpop.f32.mrb[61].mxu1  ;;  %1724 = vadd.xlane.f32.xlu0 %v1723_v60  ;;  %v1726_v2 = vsel %vm1029_vm1, %v1544_v61, 0.0 }
 0x23f   : > { %v1401_v4 = vadd.f32 %v2537_v36, %v1400_v1  ;;  %v2246_v5 = vpop.f32.mrb[62].mxu1  ;;  %1727 = vadd.xlane.f32.xlu1 %v1726_v2  ;;  %v1720_v12 = vsel %vm1029_vm1, %v1542_v3, 0.0 }
 0x240   : > { %v1412_v6 = vadd.f32 %v2246_v5, %v2537_v36  ;;  %v1403_v7 = vpop.f32.mrb[63].mxu1  ;;  %v1477_v8 = vmax.f32 %v1409_v0, 0.0 }
 0x241   : > { %v1475_v9 = vmax.f32 %v1401_v4, 0.0  ;;  %v1404_v10 = vadd.f32 %v2537_v36, %v1403_v7 }
 0x242   : > { %1718 = vadd.xlane.f32.xlu0 %v1717_v11  ;;  %v1478_v13 = vmax.f32 %v1412_v6, 0.0  ;;  %v1547_v19 = vmul.f32 %v2540_v16, %v1477_v8 }
 0x243   : > { %v1476_v14 = vmax.f32 %v1404_v10, 0.0  ;;  %1721 = vadd.xlane.f32.xlu1 %v1720_v12  ;;  %v1545_v15 = vmul.f32 %v2540_v16, %v1475_v9 }
 0x244   : > { %v1548_v20 = vmul.f32 %v2540_v16, %v1478_v13  ;;  %v1735_v21 = vsel %vm1029_vm1, %v1547_v19, 0.0 }
 0x245   : > { %v1729_v17 = vsel %vm1029_vm1, %v1545_v15, 0.0  ;;  %v1546_v18 = vmul.f32 %v2540_v16, %v1476_v14 }
 0x246   : > { %1730 = vadd.xlane.f32.xlu0 %v1729_v17  ;;  %v1738_v22 = vsel %vm1029_vm1, %v1548_v20, 0.0 }
 0x247   : > { %v1732_v36 = vsel %vm1029_vm1, %v1546_v18, 0.0 }
 0x248   : > { %1733 = vadd.xlane.f32.xlu1 %v1732_v36 }
 0x24a   : > { %1736 = vadd.xlane.f32.xlu0 %v1735_v21 }
 0x24c   : > { %1739 = vadd.xlane.f32.xlu1 %v1738_v22 }
 0x25a   : > { %v1557_v16 = vpop.xlane.xlu1 %1556 }
 0x25b   : > { %v1750_v24 = vadd.f32 %v2734_v23, %v1557_v16  ;;  %v1551_v25 = vpop.xlane.xlu0 %1550 }
 0x25c   : > { %v1748_v26 = vadd.f32 %v2734_v23, %v1551_v25 }
 0x25d   : > { %1815 = vst.msk [vmem:[%s2739_s24 + $0x10] sm:$0xff] %vm1812_vm2, %v1750_v24 }
 0x25e   : > { %1813 = vst.msk [vmem:[%s2739_s24] sm:$0xff] %vm1812_vm2, %v1748_v26  ;;  %v1560_v27 = vpop.xlane.xlu1 %1559 }
 0x25f   : > { %v1751_v28 = vadd.f32 %v2734_v23, %v1560_v27  ;;  %v1554_v29 = vpop.xlane.xlu0 %1553 }
 0x260   : > { %v1749_v30 = vadd.f32 %v2734_v23, %v1554_v29 }
 0x261   : > { %1816 = vst.msk [vmem:[%s2739_s24 + $0x18] sm:$0xff] %vm1812_vm2, %v1751_v28 }
 0x262   : > { %1814 = vst.msk [vmem:[%s2739_s24 + $0x8] sm:$0xff] %vm1812_vm2, %v1749_v30 }
 0x263   : > { %v1569_v31 = vpop.xlane.xlu0 %1568 }
 0x264   : > { %v1754_v32 = vadd.f32 %v2734_v23, %v1569_v31  ;;  %v1572_v33 = vpop.xlane.xlu1 %1571 }
 0x265   : > { %v1755_v34 = vadd.f32 %v2734_v23, %v1572_v33 }
 0x266   : > { %1819 = vst.msk [vmem:[%s2739_s24 + $0x30] sm:$0xff] %vm1812_vm2, %v1754_v32 }
 0x267   : > { %1820 = vst.msk [vmem:[%s2739_s24 + $0x38] sm:$0xff] %vm1812_vm2, %v1755_v34  ;;  %v1563_v35 = vpop.xlane.xlu0 %1562 }
 0x268   : > { %v1752_v37 = vadd.f32 %v2734_v23, %v1563_v35  ;;  %v1566_v38 = vpop.xlane.xlu1 %1565 }
 0x269   : > { %v1753_v39 = vadd.f32 %v2734_v23, %v1566_v38 }
 0x26a   : > { %1817 = vst.msk [vmem:[%s2739_s24 + $0x20] sm:$0xff] %vm1812_vm2, %v1752_v37 }
 0x26b   : > { %1818 = vst.msk [vmem:[%s2739_s24 + $0x28] sm:$0xff] %vm1812_vm2, %v1753_v39  ;;  %v1581_v40 = vpop.xlane.xlu0 %1580 }
 0x26c   : > { %v1758_v41 = vadd.f32 %v2734_v23, %v1581_v40  ;;  %v1584_v42 = vpop.xlane.xlu1 %1583 }
 0x26d   : > { %v1759_v43 = vadd.f32 %v2734_v23, %v1584_v42 }
 0x26e   : > { %1823 = vst.msk [vmem:[%s2739_s24 + $0x50] sm:$0xff] %vm1812_vm2, %v1758_v41 }
 0x26f   : > { %1824 = vst.msk [vmem:[%s2739_s24 + $0x58] sm:$0xff] %vm1812_vm2, %v1759_v43  ;;  %v1575_v44 = vpop.xlane.xlu0 %1574 }
 0x270   : > { %v1756_v45 = vadd.f32 %v2734_v23, %v1575_v44  ;;  %v1578_v46 = vpop.xlane.xlu1 %1577 }
 0x271   : > { %v1757_v47 = vadd.f32 %v2734_v23, %v1578_v46 }
 0x272   : > { %1821 = vst.msk [vmem:[%s2739_s24 + $0x40] sm:$0xff] %vm1812_vm2, %v1756_v45 }
 0x273   : > { %1822 = vst.msk [vmem:[%s2739_s24 + $0x48] sm:$0xff] %vm1812_vm2, %v1757_v47  ;;  %v1593_v48 = vpop.xlane.xlu0 %1592 }
 0x274   : > { %v1762_v49 = vadd.f32 %v2734_v23, %v1593_v48  ;;  %v1596_v50 = vpop.xlane.xlu1 %1595 }
 0x275   : > { %v1763_v51 = vadd.f32 %v2734_v23, %v1596_v50 }
 0x276   : > { %1827 = vst.msk [vmem:[%s2739_s24 + $0x70] sm:$0xff] %vm1812_vm2, %v1762_v49 }
 0x277   : > { %1828 = vst.msk [vmem:[%s2739_s24 + $0x78] sm:$0xff] %vm1812_vm2, %v1763_v51  ;;  %v1587_v52 = vpop.xlane.xlu0 %1586 }
 0x278   : > { %v1760_v53 = vadd.f32 %v2734_v23, %v1587_v52  ;;  %v1590_v54 = vpop.xlane.xlu1 %1589 }
 0x279   : > { %v1761_v55 = vadd.f32 %v2734_v23, %v1590_v54 }
 0x27a   : > { %1825 = vst.msk [vmem:[%s2739_s24 + $0x60] sm:$0xff] %vm1812_vm2, %v1760_v53 }
 0x27b   : > { %1826 = vst.msk [vmem:[%s2739_s24 + $0x68] sm:$0xff] %vm1812_vm2, %v1761_v55  ;;  %v1605_v56 = vpop.xlane.xlu0 %1604 }
 0x27c   : > { %v1766_v57 = vadd.f32 %v2734_v23, %v1605_v56  ;;  %v1608_v58 = vpop.xlane.xlu1 %1607 }
 0x27d   : > { %v1767_v59 = vadd.f32 %v2734_v23, %v1608_v58 }
 0x27e   : > { %1831 = vst.msk [vmem:[%s2739_s24 + $0x90] sm:$0xff] %vm1812_vm2, %v1766_v57 }
 0x27f   : > { %1832 = vst.msk [vmem:[%s2739_s24 + $0x98] sm:$0xff] %vm1812_vm2, %v1767_v59  ;;  %v1599_v60 = vpop.xlane.xlu0 %1598 }
 0x280   : > { %v1764_v61 = vadd.f32 %v2734_v23, %v1599_v60  ;;  %v1602_v62 = vpop.xlane.xlu1 %1601 }
 0x281   : > { %v1765_v63 = vadd.f32 %v2734_v23, %v1602_v62 }
 0x282   : > { %1829 = vst.msk [vmem:[%s2739_s24 + $0x80] sm:$0xff] %vm1812_vm2, %v1764_v61 }
 0x283   : > { %1830 = vst.msk [vmem:[%s2739_s24 + $0x88] sm:$0xff] %vm1812_vm2, %v1765_v63  ;;  %v1617_v0 = vpop.xlane.xlu0 %1616 }
 0x284   : > { %v1770_v1 = vadd.f32 %v2734_v23, %v1617_v0  ;;  %v1620_v2 = vpop.xlane.xlu1 %1619 }
 0x285   : > { %v1771_v3 = vadd.f32 %v2734_v23, %v1620_v2 }
 0x286   : > { %1835 = vst.msk [vmem:[%s2739_s24 + $0xb0] sm:$0xff] %vm1812_vm2, %v1770_v1 }
 0x287   : > { %1836 = vst.msk [vmem:[%s2739_s24 + $0xb8] sm:$0xff] %vm1812_vm2, %v1771_v3  ;;  %v1611_v4 = vpop.xlane.xlu0 %1610 }
 0x288   : > { %v1768_v5 = vadd.f32 %v2734_v23, %v1611_v4  ;;  %v1614_v6 = vpop.xlane.xlu1 %1613 }
 0x289   : > { %v1769_v7 = vadd.f32 %v2734_v23, %v1614_v6 }
 0x28a   : > { %1833 = vst.msk [vmem:[%s2739_s24 + $0xa0] sm:$0xff] %vm1812_vm2, %v1768_v5 }
 0x28b   : > { %1834 = vst.msk [vmem:[%s2739_s24 + $0xa8] sm:$0xff] %vm1812_vm2, %v1769_v7  ;;  %v1629_v8 = vpop.xlane.xlu0 %1628 }
 0x28c   : > { %v1774_v9 = vadd.f32 %v2734_v23, %v1629_v8  ;;  %v1632_v10 = vpop.xlane.xlu1 %1631 }
 0x28d   : > { %v1775_v11 = vadd.f32 %v2734_v23, %v1632_v10 }
 0x28e   : > { %1839 = vst.msk [vmem:[%s2739_s24 + $0xd0] sm:$0xff] %vm1812_vm2, %v1774_v9 }
 0x28f   : > { %1840 = vst.msk [vmem:[%s2739_s24 + $0xd8] sm:$0xff] %vm1812_vm2, %v1775_v11  ;;  %v1623_v12 = vpop.xlane.xlu0 %1622 }
 0x290   : > { %v1772_v13 = vadd.f32 %v2734_v23, %v1623_v12  ;;  %v1626_v14 = vpop.xlane.xlu1 %1625 }
 0x291   : > { %v1773_v15 = vadd.f32 %v2734_v23, %v1626_v14 }
 0x292   : > { %1837 = vst.msk [vmem:[%s2739_s24 + $0xc0] sm:$0xff] %vm1812_vm2, %v1772_v13 }
 0x293   : > { %1838 = vst.msk [vmem:[%s2739_s24 + $0xc8] sm:$0xff] %vm1812_vm2, %v1773_v15  ;;  %v1641_v17 = vpop.xlane.xlu0 %1640 }
 0x294   : > { %v1778_v18 = vadd.f32 %v2734_v23, %v1641_v17  ;;  %v1644_v19 = vpop.xlane.xlu1 %1643 }
 0x295   : > { %v1779_v36 = vadd.f32 %v2734_v23, %v1644_v19 }
 0x296   : > { %1843 = vst.msk [vmem:[%s2739_s24 + $0xf0] sm:$0xff] %vm1812_vm2, %v1778_v18 }
 0x297   : > { %1844 = vst.msk [vmem:[%s2739_s24 + $0xf8] sm:$0xff] %vm1812_vm2, %v1779_v36  ;;  %v1635_v20 = vpop.xlane.xlu0 %1634 }
 0x298   : > { %v1776_v21 = vadd.f32 %v2734_v23, %v1635_v20  ;;  %v1638_v22 = vpop.xlane.xlu1 %1637 }
 0x299   : > { %v1777_v16 = vadd.f32 %v2734_v23, %v1638_v22 }
 0x29a   : > { %1841 = vst.msk [vmem:[%s2739_s24 + $0xe0] sm:$0xff] %vm1812_vm2, %v1776_v21 }
 0x29b   : > { %1842 = vst.msk [vmem:[%s2739_s24 + $0xe8] sm:$0xff] %vm1812_vm2, %v1777_v16  ;;  %v1653_v24 = vpop.xlane.xlu0 %1652 }
 0x29c   : > { %v1782_v25 = vadd.f32 %v2734_v23, %v1653_v24  ;;  %v1656_v26 = vpop.xlane.xlu1 %1655 }
 0x29d   : > { %v1783_v27 = vadd.f32 %v2734_v23, %v1656_v26 }
 0x29e   : > { %1847 = vst.msk [vmem:[%s2739_s24 + $0x110] sm:$0xff] %vm1812_vm2, %v1782_v25 }
 0x29f   : > { %1848 = vst.msk [vmem:[%s2739_s24 + $0x118] sm:$0xff] %vm1812_vm2, %v1783_v27  ;;  %v1647_v28 = vpop.xlane.xlu0 %1646 }
 0x2a0   : > { %v1780_v29 = vadd.f32 %v2734_v23, %v1647_v28  ;;  %v1650_v30 = vpop.xlane.xlu1 %1649 }
 0x2a1   : > { %v1781_v31 = vadd.f32 %v2734_v23, %v1650_v30 }
 0x2a2   : > { %1845 = vst.msk [vmem:[%s2739_s24 + $0x100] sm:$0xff] %vm1812_vm2, %v1780_v29 }
 0x2a3   : > { %1846 = vst.msk [vmem:[%s2739_s24 + $0x108] sm:$0xff] %vm1812_vm2, %v1781_v31  ;;  %v1665_v32 = vpop.xlane.xlu0 %1664 }
 0x2a4   : > { %v1786_v33 = vadd.f32 %v2734_v23, %v1665_v32  ;;  %v1668_v34 = vpop.xlane.xlu1 %1667 }
 0x2a5   : > { %v1787_v35 = vadd.f32 %v2734_v23, %v1668_v34 }
 0x2a6   : > { %1851 = vst.msk [vmem:[%s2739_s24 + $0x130] sm:$0xff] %vm1812_vm2, %v1786_v33 }
 0x2a7   : > { %1852 = vst.msk [vmem:[%s2739_s24 + $0x138] sm:$0xff] %vm1812_vm2, %v1787_v35  ;;  %v1659_v37 = vpop.xlane.xlu0 %1658 }
 0x2a8   : > { %v1784_v38 = vadd.f32 %v2734_v23, %v1659_v37  ;;  %v1662_v39 = vpop.xlane.xlu1 %1661 }
 0x2a9   : > { %v1785_v40 = vadd.f32 %v2734_v23, %v1662_v39 }
 0x2aa   : > { %1849 = vst.msk [vmem:[%s2739_s24 + $0x120] sm:$0xff] %vm1812_vm2, %v1784_v38 }
 0x2ab   : > { %1850 = vst.msk [vmem:[%s2739_s24 + $0x128] sm:$0xff] %vm1812_vm2, %v1785_v40  ;;  %v1677_v41 = vpop.xlane.xlu0 %1676 }
 0x2ac   : > { %v1790_v42 = vadd.f32 %v2734_v23, %v1677_v41  ;;  %v1680_v43 = vpop.xlane.xlu1 %1679 }
 0x2ad   : > { %v1791_v44 = vadd.f32 %v2734_v23, %v1680_v43 }
 0x2ae   : > { %1855 = vst.msk [vmem:[%s2739_s24 + $0x150] sm:$0xff] %vm1812_vm2, %v1790_v42 }
 0x2af   : > { %1856 = vst.msk [vmem:[%s2739_s24 + $0x158] sm:$0xff] %vm1812_vm2, %v1791_v44  ;;  %v1671_v45 = vpop.xlane.xlu0 %1670 }
 0x2b0   : > { %v1788_v46 = vadd.f32 %v2734_v23, %v1671_v45  ;;  %v1674_v47 = vpop.xlane.xlu1 %1673 }
 0x2b1   : > { %v1789_v48 = vadd.f32 %v2734_v23, %v1674_v47 }
 0x2b2   : > { %1853 = vst.msk [vmem:[%s2739_s24 + $0x140] sm:$0xff] %vm1812_vm2, %v1788_v46 }
 0x2b3   : > { %1854 = vst.msk [vmem:[%s2739_s24 + $0x148] sm:$0xff] %vm1812_vm2, %v1789_v48  ;;  %v1689_v49 = vpop.xlane.xlu0 %1688 }
 0x2b4   : > { %v1794_v50 = vadd.f32 %v2734_v23, %v1689_v49  ;;  %v1692_v51 = vpop.xlane.xlu1 %1691 }
 0x2b5   : > { %v1795_v52 = vadd.f32 %v2734_v23, %v1692_v51 }
 0x2b6   : > { %1859 = vst.msk [vmem:[%s2739_s24 + $0x170] sm:$0xff] %vm1812_vm2, %v1794_v50 }
 0x2b7   : > { %1860 = vst.msk [vmem:[%s2739_s24 + $0x178] sm:$0xff] %vm1812_vm2, %v1795_v52  ;;  %v1683_v53 = vpop.xlane.xlu0 %1682 }
 0x2b8   : > { %v1792_v54 = vadd.f32 %v2734_v23, %v1683_v53  ;;  %v1686_v55 = vpop.xlane.xlu1 %1685 }
 0x2b9   : > { %v1793_v56 = vadd.f32 %v2734_v23, %v1686_v55 }
 0x2ba   : > { %1857 = vst.msk [vmem:[%s2739_s24 + $0x160] sm:$0xff] %vm1812_vm2, %v1792_v54 }
 0x2bb   : > { %1858 = vst.msk [vmem:[%s2739_s24 + $0x168] sm:$0xff] %vm1812_vm2, %v1793_v56  ;;  %v1701_v57 = vpop.xlane.xlu0 %1700 }
 0x2bc   : > { %v1798_v58 = vadd.f32 %v2734_v23, %v1701_v57  ;;  %v1704_v59 = vpop.xlane.xlu1 %1703 }
 0x2bd   : > { %v1799_v60 = vadd.f32 %v2734_v23, %v1704_v59 }
 0x2be   : > { %1863 = vst.msk [vmem:[%s2739_s24 + $0x190] sm:$0xff] %vm1812_vm2, %v1798_v58 }
 0x2bf   : > { %1864 = vst.msk [vmem:[%s2739_s24 + $0x198] sm:$0xff] %vm1812_vm2, %v1799_v60  ;;  %v1695_v61 = vpop.xlane.xlu0 %1694 }
 0x2c0   : > { %v1796_v62 = vadd.f32 %v2734_v23, %v1695_v61  ;;  %v1698_v63 = vpop.xlane.xlu1 %1697 }
 0x2c1   : > { %v1797_v0 = vadd.f32 %v2734_v23, %v1698_v63 }
 0x2c2   : > { %1861 = vst.msk [vmem:[%s2739_s24 + $0x180] sm:$0xff] %vm1812_vm2, %v1796_v62 }
 0x2c3   : > { %1862 = vst.msk [vmem:[%s2739_s24 + $0x188] sm:$0xff] %vm1812_vm2, %v1797_v0  ;;  %v1713_v1 = vpop.xlane.xlu0 %1712 }
 0x2c4   : > { %v1802_v2 = vadd.f32 %v2734_v23, %v1713_v1  ;;  %v1716_v3 = vpop.xlane.xlu1 %1715 }
 0x2c5   : > { %v1803_v4 = vadd.f32 %v2734_v23, %v1716_v3 }
 0x2c6   : > { %1867 = vst.msk [vmem:[%s2739_s24 + $0x1b0] sm:$0xff] %vm1812_vm2, %v1802_v2 }
 0x2c7   : > { %1868 = vst.msk [vmem:[%s2739_s24 + $0x1b8] sm:$0xff] %vm1812_vm2, %v1803_v4  ;;  %v1707_v5 = vpop.xlane.xlu0 %1706 }
 0x2c8   : > { %v1800_v6 = vadd.f32 %v2734_v23, %v1707_v5  ;;  %v1710_v7 = vpop.xlane.xlu1 %1709 }
 0x2c9   : > { %v1801_v8 = vadd.f32 %v2734_v23, %v1710_v7 }
 0x2ca   : > { %1865 = vst.msk [vmem:[%s2739_s24 + $0x1a0] sm:$0xff] %vm1812_vm2, %v1800_v6 }
 0x2cb   : > { %1866 = vst.msk [vmem:[%s2739_s24 + $0x1a8] sm:$0xff] %vm1812_vm2, %v1801_v8  ;;  %v1725_v9 = vpop.xlane.xlu0 %1724 }
 0x2cc   : > { %v1806_v10 = vadd.f32 %v2734_v23, %v1725_v9  ;;  %v1728_v11 = vpop.xlane.xlu1 %1727 }
 0x2cd   : > { %v1807_v12 = vadd.f32 %v2734_v23, %v1728_v11 }
 0x2ce   : > { %1871 = vst.msk [vmem:[%s2739_s24 + $0x1d0] sm:$0xff] %vm1812_vm2, %v1806_v10 }
 0x2cf   : > { %1872 = vst.msk [vmem:[%s2739_s24 + $0x1d8] sm:$0xff] %vm1812_vm2, %v1807_v12  ;;  %v1719_v13 = vpop.xlane.xlu0 %1718 }
 0x2d0   : > { %v1804_v14 = vadd.f32 %v2734_v23, %v1719_v13  ;;  %v1722_v15 = vpop.xlane.xlu1 %1721 }
 0x2d1   : > { %v1805_v17 = vadd.f32 %v2734_v23, %v1722_v15 }
 0x2d2   : > { %1869 = vst.msk [vmem:[%s2739_s24 + $0x1c0] sm:$0xff] %vm1812_vm2, %v1804_v14 }
 0x2d3   : > { %1870 = vst.msk [vmem:[%s2739_s24 + $0x1c8] sm:$0xff] %vm1812_vm2, %v1805_v17  ;;  %v1731_v18 = vpop.xlane.xlu0 %1730 }
 0x2d4   : > { %v1808_v19 = vadd.f32 %v2734_v23, %v1731_v18 }
 0x2d5   : > { %v1734_v36 = vpop.xlane.xlu1 %1733 }
 0x2d6   : > { %1873 = vst.msk [vmem:[%s2739_s24 + $0x1e0] sm:$0xff] %vm1812_vm2, %v1808_v19  ;;  %v1809_v20 = vadd.f32 %v2734_v23, %v1734_v36 }
 0x2d7   : > { %v1737_v21 = vpop.xlane.xlu0 %1736 }
 0x2d8   : > { %1874 = vst.msk [vmem:[%s2739_s24 + $0x1e8] sm:$0xff] %vm1812_vm2, %v1809_v20  ;;  %v1810_v22 = vadd.f32 %v2734_v23, %v1737_v21 }
 0x2d9   : > { %v1740_v16 = vpop.xlane.xlu1 %1739 }
 0x2da   : > { %1875 = vst.msk [vmem:[%s2739_s24 + $0x1f0] sm:$0xff] %vm1812_vm2, %v1810_v22  ;;  %v1811_v24 = vadd.f32 %v2734_v23, %v1740_v16 }
 0x2dc   : > { %1876 = vst.msk [vmem:[%s2739_s24 + $0x1f8] sm:$0xff] %vm1812_vm2, %v1811_v24 }
 0x2dd PF: > { %s19_s26 = sadd.s32 1, %s2296_s26  }
 0x2de   : > { %p16_p4 = scmp.ge.s32.totalorder %s19_s26, 4  }
 0x2e0   :  { %18 = sbr.rel (!%p16_p4) target bundleno = 3 (0x3), region = 78 }

</bundles_post_ra>
